<compile_context>
chip_gen: v7x
topology: tpu7x:2x2x1
jax: 0.10.0
libtpu: 0.0.40
codegen_flags: <defaults>
</compile_context>

<pallas_src>
import functools

import jax
import jax.numpy as jnp
import numpy as np
from jax.experimental import pallas as pl
from jax.experimental.pallas import tpu as pltpu


def _gcn_kernel(text_ref, pos_ref, dep_ref, adj_ref,
                wa_t_ref, wa_p_ref, wa_d_ref, ba_ref,
                wp_ref, bp_ref, wd_ref, bd_ref,
                r_ref, outsum_ref, p_ref,
                *, approx_recip):
    # Block shapes: text [1,Ti,F], pos [1,Ti,P], dep [1,Ti,S,D], adj [1,Ti,S]
    _, Ti, S, D = dep_ref.shape
    O = r_ref.shape[-1]
    cdt = wa_d_ref.dtype                       # MXU compute dtype (bf16 or f32)

    text = text_ref[0]                         # [Ti, F]     f32
    pos = pos_ref[0]                           # [Ti, P]     f32
    dep = dep_ref[0]                           # [Ti, S, D]  f32
    adj = adj_ref[0]                           # [Ti, S]     f32

    text_c = text.astype(cdt)
    pos_c = pos.astype(cdt)
    dep_flat = dep.reshape(Ti * S, D).astype(cdt)

    # ---- r = dep_attn(cat([val_us, pos_us, dep_embed], -1)) -----------------
    # dep_attn weight is column-split (concat order: text, pos, dep). The text
    # and pos contributions depend only on the row i -> two tiny [Ti,*] matmuls.
    row_attn = (jnp.dot(text_c, wa_t_ref[...], preferred_element_type=jnp.float32)
                + jnp.dot(pos_c, wa_p_ref[...], preferred_element_type=jnp.float32)
                + ba_ref[0])                                         # [Ti, O]
    # Dominant matmul: one flat [Ti*S, D] x [D, O] MXU op.
    a_dep = jnp.dot(dep_flat, wa_d_ref[...],
                    preferred_element_type=jnp.float32)              # [Ti*S, O]
    r = a_dep.reshape(Ti, S, O) + row_attn[:, None, :]               # [Ti, S, O]
    r_ref[0] = r.astype(r_ref.dtype)

    # ---- p = softmax(sum(r, -1) + mask, over j) ------------------------------
    logits = jnp.sum(r, axis=-1)                                     # [Ti, S]
    logits = jnp.where(adj == 0, jnp.float32(-1e30), logits)
    m = jnp.max(logits, axis=-1, keepdims=True)
    e = jnp.exp(logits - m)
    p = e * pl.reciprocal(jnp.sum(e, axis=-1, keepdims=True), approx=approx_recip)
    p_ref[0] = p.astype(p_ref.dtype)

    # ---- output_sum (aggregate-then-transform) -------------------------------
    # sum_j p_ij == 1, so
    #   output_sum_i = text_i + pos_i @ Wp + bp + (sum_j p_ij * dep_ij) @ Wd + bd
    agg = jnp.sum(dep * p[:, :, None], axis=1)                       # [Ti, D]
    pos_out = (jnp.dot(pos_c, wp_ref[...], preferred_element_type=jnp.float32)
               + bp_ref[0])                                          # [Ti, O]
    dep_out = (jnp.dot(agg.astype(cdt), wd_ref[...],
                       preferred_element_type=jnp.float32)
               + bd_ref[0])                                          # [Ti, O]
    outsum_ref[0] = (text + pos_out + dep_out).astype(outsum_ref.dtype)


def _pick_row_tile(S, D, O, F, P, budget_bytes=20 << 20):
    """Largest row-tile Ti that divides S, satisfies the sublane rule
    (Ti % 8 == 0 or Ti == S) and keeps double-buffered blocks under budget."""
    def step_bytes(ti):
        per_step = (ti * S * (D + O)            # dep block + r block
                    + ti * (F + P + 2 * S + O)  # text, pos, adj, p, outsum
                    ) * 4
        return 2 * per_step                     # double-buffered
    cands = [t for t in range(S, 0, -1) if S % t == 0 and (t % 8 == 0 or t == S)]
    for t in cands:
        if step_bytes(t) <= budget_bytes:
            return t
    return cands[-1]


def syntax_aware_gcn(text, adj, dep_embed, pos_embed, params, *,
                     compute_dtype=jnp.bfloat16, row_tile=None,
                     vmem_limit_bytes=64 * 1024 * 1024):
    """SyntaxAwareGCN forward. Returns (r, output_sum, p) (PyTorch layout)."""
    B, S, F = text.shape
    P = pos_embed.shape[-1]
    D = dep_embed.shape[-1]
    O = params['wa_t'].shape[-1]
    assert F == O, "forward() semantics require feat_dim == out_features"

    Ti = row_tile if row_tile is not None else _pick_row_tile(S, D, O, F, P)
    assert S % Ti == 0

    # Weights carried in the MXU compute dtype; biases stay f32 (added post-acc).
    wa_t = params['wa_t'].astype(compute_dtype)
    wa_p = params['wa_p'].astype(compute_dtype)
    wa_d = params['wa_d'].astype(compute_dtype)
    wp = params['wp'].astype(compute_dtype)
    wd = params['wd'].astype(compute_dtype)
    ba = params['ba'].astype(jnp.float32)
    bp = params['bp'].astype(jnp.float32)
    bd = params['bd'].astype(jnp.float32)

    def whole(arr):  # full (untiled) 2-D weight/bias, constant across the grid
        return pl.BlockSpec(arr.shape, lambda b, i: (0, 0))

    grid_spec = pltpu.PrefetchScalarGridSpec(
        num_scalar_prefetch=0,
        grid=(B, S // Ti),
        in_specs=[
            pl.BlockSpec((1, Ti, F), lambda b, i: (b, i, 0)),        # text
            pl.BlockSpec((1, Ti, P), lambda b, i: (b, i, 0)),        # pos_embed
            pl.BlockSpec((1, Ti, S, D), lambda b, i: (b, i, 0, 0)),  # dep_embed
            pl.BlockSpec((1, Ti, S), lambda b, i: (b, i, 0)),        # adj
            whole(wa_t), whole(wa_p), whole(wa_d), whole(ba),        # dep_attn
            whole(wp), whole(bp),                                    # pos_fc
            whole(wd), whole(bd),                                    # dep_fc
        ],
        out_specs=[
            pl.BlockSpec((1, Ti, S, O), lambda b, i: (b, i, 0, 0)),  # r
            pl.BlockSpec((1, Ti, O), lambda b, i: (b, i, 0)),        # output_sum
            pl.BlockSpec((1, Ti, S), lambda b, i: (b, i, 0)),        # p
        ],
    )

    kernel = functools.partial(_gcn_kernel,
                               approx_recip=(compute_dtype != jnp.float32))

    return pl.pallas_call(
        kernel,
        out_shape=(
            jax.ShapeDtypeStruct((B, S, S, O), jnp.float32),
            jax.ShapeDtypeStruct((B, S, O), jnp.float32),
            jax.ShapeDtypeStruct((B, S, S), jnp.float32),
        ),
        grid_spec=grid_spec,
        compiler_params=pltpu.CompilerParams(
            dimension_semantics=("parallel", "parallel"),
            vmem_limit_bytes=vmem_limit_bytes),
    )(text, pos_embed, dep_embed, adj,
      wa_t, wa_p, wa_d, ba, wp, bp, wd, bd)


def _reference(text, adj, dep_embed, pos_embed, params, compute_dtype=jnp.float32):
    """Plain-JAX reference mirroring the PyTorch forward. With a non-f32
    compute_dtype it applies the same operand casts as the kernel (f32 accum)."""
    B, S, F = text.shape
    P = pos_embed.shape[-1]
    c = lambda x: x.astype(compute_dtype)
    ee = functools.partial(jnp.einsum, preferred_element_type=jnp.float32)
    val_us = jnp.broadcast_to(text[:, :, None, :], (B, S, S, F))
    pos_us = jnp.broadcast_to(pos_embed[:, :, None, :], (B, S, S, P))
    r = (ee('bijf,fo->bijo', c(val_us), c(params['wa_t']))
         + ee('bijp,po->bijo', c(pos_us), c(params['wa_p']))
         + ee('bijd,do->bijo', c(dep_embed), c(params['wa_d']))
         + params['ba'][0])
    logits = jnp.sum(r, axis=-1) + (adj == 0).astype(jnp.float32) * (-1e30)
    p = jax.nn.softmax(logits, axis=2)
    output = (val_us
              + ee('bijp,po->bijo', c(pos_us), c(params['wp'])) + params['bp'][0]
              + ee('bijd,do->bijo', c(dep_embed), c(params['wd'])) + params['bd'][0])
    output_sum = jnp.sum(p[..., None] * output, axis=2)
    return r, output_sum, p


def _init_params(key, dep_dim, pos_dim, in_features, out_features):
    """Deterministic PyTorch-Linear-style init (uniform +/- 1/sqrt(fan_in))."""
    def linear(k, fan_in, fan_out):
        kw, kb = jax.random.split(k)
        bound = 1.0 / np.sqrt(fan_in)
        w = jax.random.uniform(kw, (fan_in, fan_out), jnp.float32, -bound, bound)
        b = jax.random.uniform(kb, (1, fan_out), jnp.float32, -bound, bound)
        return w, b

    k1, k2, k3 = jax.random.split(key, 3)
    attn_in = out_features + pos_dim + dep_dim   # concat order: text, pos, dep
    wa, ba = linear(k1, attn_in, out_features)
    wp, bp = linear(k2, pos_dim, out_features)
    wd, bd = linear(k3, dep_dim, out_features)
    return {
        'wa_t': wa[:out_features, :],
        'wa_p': wa[out_features:out_features + pos_dim, :],
        'wa_d': wa[out_features + pos_dim:, :],
        'ba': ba,
        'wp': wp, 'bp': bp,
        'wd': wd, 'bd': bd,
    }


if __name__ == "__main__":
    B, S = 2, 8
    F = OUT = 32          # forward requires feat_dim == out_features
    P = 8                 # pos_dim
    D = 16                # dep_dim

    key = jax.random.PRNGKey(0)
    k_text, k_pos, k_dep, k_adj, k_par = jax.random.split(key, 5)

    text = jax.random.normal(k_text, (B, S, F), jnp.float32)
    pos_embed = jax.random.normal(k_pos, (B, S, P), jnp.float32)
    dep_embed = jax.random.normal(k_dep, (B, S, S, D), jnp.float32)
    adj = (jax.random.uniform(k_adj, (B, S, S)) > 0.4).astype(jnp.float32)
    # Guarantee at least one unmasked neighbor per row (self-loop).
    adj = jnp.maximum(adj, jnp.eye(S, dtype=jnp.float32)[None])

    params = _init_params(k_par, D, P, F, OUT)

    # --- exact path (f32 MXU operands): strict check vs. plain-JAX reference --
    r32, out32, p32 = jax.block_until_ready(
        syntax_aware_gcn(text, adj, dep_embed, pos_embed, params,
                         compute_dtype=jnp.float32))
    r_ref, o_ref, p_ref = _reference(text, adj, dep_embed, pos_embed, params)
    np.testing.assert_allclose(np.asarray(r32), np.asarray(r_ref), rtol=1e-4, atol=1e-4)
    np.testing.assert_allclose(np.asarray(p32), np.asarray(p_ref), rtol=1e-4, atol=1e-4)
    np.testing.assert_allclose(np.asarray(out32), np.asarray(o_ref), rtol=1e-4, atol=1e-4)

    # --- fast path (bf16 MXU operands, f32 accumulation): checked against a
    #     reference that applies the identical bf16 operand casts -------------
    rb, ob, pb = jax.block_until_ready(
        syntax_aware_gcn(text, adj, dep_embed, pos_embed, params,
                         compute_dtype=jnp.bfloat16))
    r_refb, o_refb, p_refb = _reference(text, adj, dep_embed, pos_embed, params,
                                        compute_dtype=jnp.bfloat16)
    np.testing.assert_allclose(np.asarray(rb), np.asarray(r_refb), rtol=2e-2, atol=2e-2)
    np.testing.assert_allclose(np.asarray(pb), np.asarray(p_refb), rtol=2e-2, atol=2e-2)
    np.testing.assert_allclose(np.asarray(ob), np.asarray(o_refb), rtol=2e-2, atol=2e-2)

    print("KERNEL_OK")
</pallas_src>

<mosaic_0001>
module attributes {stable_mosaic.version = 11 : i64} {
  func.func @_gcn_kernel(%arg0: i32, %arg1: i32, %arg2: memref<1x8x32xf32, #tpu.memory_space<vmem>>, %arg3: memref<1x8x8xf32, #tpu.memory_space<vmem>>, %arg4: memref<1x8x8x16xf32, #tpu.memory_space<vmem>>, %arg5: memref<1x8x8xf32, #tpu.memory_space<vmem>>, %arg6: memref<32x32xf32, #tpu.memory_space<vmem>>, %arg7: memref<8x32xf32, #tpu.memory_space<vmem>>, %arg8: memref<16x32xf32, #tpu.memory_space<vmem>>, %arg9: memref<1x32xf32, #tpu.memory_space<vmem>>, %arg10: memref<8x32xf32, #tpu.memory_space<vmem>>, %arg11: memref<1x32xf32, #tpu.memory_space<vmem>>, %arg12: memref<16x32xf32, #tpu.memory_space<vmem>>, %arg13: memref<1x32xf32, #tpu.memory_space<vmem>>, %arg14: memref<1x8x8x32xf32, #tpu.memory_space<vmem>>, %arg15: memref<1x8x32xf32, #tpu.memory_space<vmem>>, %arg16: memref<1x8x8xf32, #tpu.memory_space<vmem>>) attributes {dimension_semantics = [#tpu.dimension_semantics<parallel>, #tpu.dimension_semantics<parallel>], iteration_bounds = array<i64: 2, 1>, scalar_prefetch = 0 : i64, scratch_operands = 0 : i64, tpu.core_type = #tpu.core_type<tc>, window_params = [{transform_indices = @transform_0, window_bounds = array<i64: 1, 8, 32>}, {transform_indices = @transform_1, window_bounds = array<i64: 1, 8, 8>}, {transform_indices = @transform_2, window_bounds = array<i64: 1, 8, 8, 16>}, {transform_indices = @transform_3, window_bounds = array<i64: 1, 8, 8>}, {pipeline_mode = #tpu.pipeline_mode<synchronous>, transform_indices = @transform_4, window_bounds = array<i64: 32, 32>}, {pipeline_mode = #tpu.pipeline_mode<synchronous>, transform_indices = @transform_5, window_bounds = array<i64: 8, 32>}, {pipeline_mode = #tpu.pipeline_mode<synchronous>, transform_indices = @transform_6, window_bounds = array<i64: 16, 32>}, {pipeline_mode = #tpu.pipeline_mode<synchronous>, transform_indices = @transform_7, window_bounds = array<i64: 1, 32>}, {pipeline_mode = #tpu.pipeline_mode<synchronous>, transform_indices = @transform_8, window_bounds = array<i64: 8, 32>}, {pipeline_mode = #tpu.pipeline_mode<synchronous>, transform_indices = @transform_9, window_bounds = array<i64: 1, 32>}, {pipeline_mode = #tpu.pipeline_mode<synchronous>, transform_indices = @transform_10, window_bounds = array<i64: 16, 32>}, {pipeline_mode = #tpu.pipeline_mode<synchronous>, transform_indices = @transform_11, window_bounds = array<i64: 1, 32>}, {transform_indices = @transform_12, window_bounds = array<i64: 1, 8, 8, 32>}, {transform_indices = @transform_13, window_bounds = array<i64: 1, 8, 32>}, {transform_indices = @transform_14, window_bounds = array<i64: 1, 8, 8>}]} {
    %c0 = arith.constant 0 : index
    %c0_0 = arith.constant 0 : index
    %c0_1 = arith.constant 0 : index
    %0 = vector.load %arg2[%c0, %c0_0, %c0_1] : memref<1x8x32xf32, #tpu.memory_space<vmem>>, vector<1x8x32xf32>
    %1 = vector.shape_cast %0 : vector<1x8x32xf32> to vector<8x32xf32>
    %c0_2 = arith.constant 0 : index
    %c0_3 = arith.constant 0 : index
    %c0_4 = arith.constant 0 : index
    %2 = vector.load %arg3[%c0_2, %c0_3, %c0_4] : memref<1x8x8xf32, #tpu.memory_space<vmem>>, vector<1x8x8xf32>
    %3 = vector.shape_cast %2 : vector<1x8x8xf32> to vector<8x8xf32>
    %c0_5 = arith.constant 0 : index
    %c0_6 = arith.constant 0 : index
    %c0_7 = arith.constant 0 : index
    %c0_8 = arith.constant 0 : index
    %4 = vector.load %arg4[%c0_5, %c0_6, %c0_7, %c0_8] : memref<1x8x8x16xf32, #tpu.memory_space<vmem>>, vector<1x8x8x16xf32>
    %5 = vector.shape_cast %4 : vector<1x8x8x16xf32> to vector<8x8x16xf32>
    %c0_9 = arith.constant 0 : index
    %c0_10 = arith.constant 0 : index
    %c0_11 = arith.constant 0 : index
    %6 = vector.load %arg5[%c0_9, %c0_10, %c0_11] : memref<1x8x8xf32, #tpu.memory_space<vmem>>, vector<1x8x8xf32>
    %7 = vector.shape_cast %6 : vector<1x8x8xf32> to vector<8x8xf32>
    %8 = vector.shape_cast %5 : vector<8x8x16xf32> to vector<64x16xf32>
    %c0_12 = arith.constant 0 : index
    %c0_13 = arith.constant 0 : index
    %9 = vector.load %arg6[%c0_12, %c0_13] : memref<32x32xf32, #tpu.memory_space<vmem>>, vector<32x32xf32>
    %cst = arith.constant dense<0.000000e+00> : vector<8x32xf32>
    %10 = tpu.matmul %1, %9, %cst {dimension_numbers = #tpu.dot_dimension_numbers<[1], [0], [0], [1], [0, 0, 1, 1], [], []>} : vector<8x32xf32>, vector<32x32xf32>, vector<8x32xf32> -> vector<8x32xf32>
    %c0_14 = arith.constant 0 : index
    %c0_15 = arith.constant 0 : index
    %11 = vector.load %arg7[%c0_14, %c0_15] : memref<8x32xf32, #tpu.memory_space<vmem>>, vector<8x32xf32>
    %cst_16 = arith.constant dense<0.000000e+00> : vector<8x32xf32>
    %12 = tpu.matmul %3, %11, %cst_16 {dimension_numbers = #tpu.dot_dimension_numbers<[1], [0], [0], [1], [0, 0, 1, 1], [], []>} : vector<8x8xf32>, vector<8x32xf32>, vector<8x32xf32> -> vector<8x32xf32>
    %13 = arith.addf %10, %12 : vector<8x32xf32>
    %c0_17 = arith.constant 0 : index
    %c0_18 = arith.constant 0 : index
    %14 = vector.load %arg9[%c0_17, %c0_18] : memref<1x32xf32, #tpu.memory_space<vmem>>, vector<1x32xf32>
    %15 = vector.shape_cast %14 : vector<1x32xf32> to vector<32xf32>
    %16 = vector.shape_cast %15 : vector<32xf32> to vector<1x32xf32>
    %17 = vector.broadcast %16 : vector<1x32xf32> to vector<8x32xf32>
    %18 = arith.addf %13, %17 : vector<8x32xf32>
    %c0_19 = arith.constant 0 : index
    %c0_20 = arith.constant 0 : index
    %19 = vector.load %arg8[%c0_19, %c0_20] : memref<16x32xf32, #tpu.memory_space<vmem>>, vector<16x32xf32>
    %cst_21 = arith.constant dense<0.000000e+00> : vector<64x32xf32>
    %20 = tpu.matmul %8, %19, %cst_21 {dimension_numbers = #tpu.dot_dimension_numbers<[1], [0], [0], [1], [0, 0, 1, 1], [], []>} : vector<64x16xf32>, vector<16x32xf32>, vector<64x32xf32> -> vector<64x32xf32>
    %21 = vector.shape_cast %20 : vector<64x32xf32> to vector<8x8x32xf32>
    %22 = vector.shape_cast %18 : vector<8x32xf32> to vector<8x1x32xf32>
    %23 = vector.broadcast %22 : vector<8x1x32xf32> to vector<8x8x32xf32>
    %24 = arith.addf %21, %23 : vector<8x8x32xf32>
    %c0_22 = arith.constant 0 : index
    %c0_23 = arith.constant 0 : index
    %c0_24 = arith.constant 0 : index
    %c0_25 = arith.constant 0 : index
    %25 = vector.load %arg14[%c0_22, %c0_23, %c0_24, %c0_25] : memref<1x8x8x32xf32, #tpu.memory_space<vmem>>, vector<1x8x8x32xf32>
    %26 = vector.shape_cast %25 : vector<1x8x8x32xf32> to vector<8x8x32xf32>
    %27 = vector.shape_cast %24 : vector<8x8x32xf32> to vector<1x8x8x32xf32>
    tpu.vector_store %arg14[%c0_22, %c0_23, %c0_24, %c0_25], %27 {strides = array<i32>} : memref<1x8x8x32xf32, #tpu.memory_space<vmem>>, vector<1x8x8x32xf32>,
    %cst_26 = arith.constant dense<0.000000e+00> : vector<8x8xf32>
    %28 = vector.multi_reduction <add>, %24, %cst_26 [2] : vector<8x8x32xf32> to vector<8x8xf32>
    %cst_27 = arith.constant 0.000000e+00 : f32
    %29 = vector.broadcast %cst_27 : f32 to vector<8x8xf32>
    %30 = arith.cmpf oeq, %7, %29 : vector<8x8xf32>
    %cst_28 = arith.constant -1.000000e+30 : f32
    %31 = vector.broadcast %cst_28 : f32 to vector<8x8xf32>
    %32 = arith.select %30, %31, %28 : vector<8x8xi1>, vector<8x8xf32>
    %cst_29 = arith.constant dense<0xFF800000> : vector<8xf32>
    %33 = vector.multi_reduction <maximumf>, %32, %cst_29 [1] : vector<8x8xf32> to vector<8xf32>
    %34 = vector.shape_cast %33 : vector<8xf32> to vector<8x1xf32>
    %35 = vector.broadcast %34 : vector<8x1xf32> to vector<8x8xf32>
    %36 = arith.subf %32, %35 : vector<8x8xf32>
    %37 = math.exp %36 : vector<8x8xf32>
    %cst_30 = arith.constant dense<0.000000e+00> : vector<8xf32>
    %38 = vector.multi_reduction <add>, %37, %cst_30 [1] : vector<8x8xf32> to vector<8xf32>
    %39 = vector.shape_cast %38 : vector<8xf32> to vector<8x1xf32>
    %40 = tpu.reciprocal %39 : vector<8x1xf32> -> vector<8x1xf32>
    %41 = vector.broadcast %40 : vector<8x1xf32> to vector<8x8xf32>
    %42 = arith.mulf %37, %41 : vector<8x8xf32>
    %c0_31 = arith.constant 0 : index
    %c0_32 = arith.constant 0 : index
    %c0_33 = arith.constant 0 : index
    %43 = vector.load %arg16[%c0_31, %c0_32, %c0_33] : memref<1x8x8xf32, #tpu.memory_space<vmem>>, vector<1x8x8xf32>
    %44 = vector.shape_cast %43 : vector<1x8x8xf32> to vector<8x8xf32>
    %45 = vector.shape_cast %42 : vector<8x8xf32> to vector<1x8x8xf32>
    tpu.vector_store %arg16[%c0_31, %c0_32, %c0_33], %45 {strides = array<i32>} : memref<1x8x8xf32, #tpu.memory_space<vmem>>, vector<1x8x8xf32>,
    %46 = vector.shape_cast %42 : vector<8x8xf32> to vector<8x8x1xf32>
    %47 = vector.broadcast %46 : vector<8x8x1xf32> to vector<8x8x16xf32>
    %48 = arith.mulf %5, %47 : vector<8x8x16xf32>
    %cst_34 = arith.constant dense<0.000000e+00> : vector<8x16xf32>
    %49 = vector.multi_reduction <add>, %48, %cst_34 [1] : vector<8x8x16xf32> to vector<8x16xf32>
    %c0_35 = arith.constant 0 : index
    %c0_36 = arith.constant 0 : index
    %50 = vector.load %arg10[%c0_35, %c0_36] : memref<8x32xf32, #tpu.memory_space<vmem>>, vector<8x32xf32>
    %cst_37 = arith.constant dense<0.000000e+00> : vector<8x32xf32>
    %51 = tpu.matmul %3, %50, %cst_37 {dimension_numbers = #tpu.dot_dimension_numbers<[1], [0], [0], [1], [0, 0, 1, 1], [], []>} : vector<8x8xf32>, vector<8x32xf32>, vector<8x32xf32> -> vector<8x32xf32>
    %c0_38 = arith.constant 0 : index
    %c0_39 = arith.constant 0 : index
    %52 = vector.load %arg11[%c0_38, %c0_39] : memref<1x32xf32, #tpu.memory_space<vmem>>, vector<1x32xf32>
    %53 = vector.shape_cast %52 : vector<1x32xf32> to vector<32xf32>
    %54 = vector.shape_cast %53 : vector<32xf32> to vector<1x32xf32>
    %55 = vector.broadcast %54 : vector<1x32xf32> to vector<8x32xf32>
    %56 = arith.addf %51, %55 : vector<8x32xf32>
    %c0_40 = arith.constant 0 : index
    %c0_41 = arith.constant 0 : index
    %57 = vector.load %arg12[%c0_40, %c0_41] : memref<16x32xf32, #tpu.memory_space<vmem>>, vector<16x32xf32>
    %cst_42 = arith.constant dense<0.000000e+00> : vector<8x32xf32>
    %58 = tpu.matmul %49, %57, %cst_42 {dimension_numbers = #tpu.dot_dimension_numbers<[1], [0], [0], [1], [0, 0, 1, 1], [], []>} : vector<8x16xf32>, vector<16x32xf32>, vector<8x32xf32> -> vector<8x32xf32>
    %c0_43 = arith.constant 0 : index
    %c0_44 = arith.constant 0 : index
    %59 = vector.load %arg13[%c0_43, %c0_44] : memref<1x32xf32, #tpu.memory_space<vmem>>, vector<1x32xf32>
    %60 = vector.shape_cast %59 : vector<1x32xf32> to vector<32xf32>
    %61 = vector.shape_cast %60 : vector<32xf32> to vector<1x32xf32>
    %62 = vector.broadcast %61 : vector<1x32xf32> to vector<8x32xf32>
    %63 = arith.addf %58, %62 : vector<8x32xf32>
    %64 = arith.addf %1, %56 : vector<8x32xf32>
    %65 = arith.addf %64, %63 : vector<8x32xf32>
    %c0_45 = arith.constant 0 : index
    %c0_46 = arith.constant 0 : index
    %c0_47 = arith.constant 0 : index
    %66 = vector.load %arg15[%c0_45, %c0_46, %c0_47] : memref<1x8x32xf32, #tpu.memory_space<vmem>>, vector<1x8x32xf32>
    %67 = vector.shape_cast %66 : vector<1x8x32xf32> to vector<8x32xf32>
    %68 = vector.shape_cast %65 : vector<8x32xf32> to vector<1x8x32xf32>
    tpu.vector_store %arg15[%c0_45, %c0_46, %c0_47], %68 {strides = array<i32>} : memref<1x8x32xf32, #tpu.memory_space<vmem>>, vector<1x8x32xf32>,
    return
  }
  func.func @transform_0(%arg0: i32, %arg1: i32) -> (i32, i32, i32) {
    %c0_i32 = arith.constant 0 : i32
    %c0_i32_0 = arith.constant 0 : i32
    return %arg0, %arg1, %c0_i32 : i32, i32, i32
  }
  func.func @transform_1(%arg0: i32, %arg1: i32) -> (i32, i32, i32) {
    %c0_i32 = arith.constant 0 : i32
    %c0_i32_0 = arith.constant 0 : i32
    return %arg0, %arg1, %c0_i32 : i32, i32, i32
  }
  func.func @transform_2(%arg0: i32, %arg1: i32) -> (i32, i32, i32, i32) {
    %c0_i32 = arith.constant 0 : i32
    %c0_i32_0 = arith.constant 0 : i32
    %c0_i32_1 = arith.constant 0 : i32
    return %arg0, %arg1, %c0_i32, %c0_i32_0 : i32, i32, i32, i32
  }
  func.func @transform_3(%arg0: i32, %arg1: i32) -> (i32, i32, i32) {
    %c0_i32 = arith.constant 0 : i32
    %c0_i32_0 = arith.constant 0 : i32
    return %arg0, %arg1, %c0_i32 : i32, i32, i32
  }
  func.func @transform_4(%arg0: i32, %arg1: i32) -> (i32, i32) {
    %c0_i32 = arith.constant 0 : i32
    %c0_i32_0 = arith.constant 0 : i32
    %c0_i32_1 = arith.constant 0 : i32
    return %c0_i32, %c0_i32_0 : i32, i32
  }
  func.func @transform_5(%arg0: i32, %arg1: i32) -> (i32, i32) {
    %c0_i32 = arith.constant 0 : i32
    %c0_i32_0 = arith.constant 0 : i32
    %c0_i32_1 = arith.constant 0 : i32
    return %c0_i32, %c0_i32_0 : i32, i32
  }
  func.func @transform_6(%arg0: i32, %arg1: i32) -> (i32, i32) {
    %c0_i32 = arith.constant 0 : i32
    %c0_i32_0 = arith.constant 0 : i32
    %c0_i32_1 = arith.constant 0 : i32
    return %c0_i32, %c0_i32_0 : i32, i32
  }
  func.func @transform_7(%arg0: i32, %arg1: i32) -> (i32, i32) {
    %c0_i32 = arith.constant 0 : i32
    %c0_i32_0 = arith.constant 0 : i32
    %c0_i32_1 = arith.constant 0 : i32
    return %c0_i32, %c0_i32_0 : i32, i32
  }
  func.func @transform_8(%arg0: i32, %arg1: i32) -> (i32, i32) {
    %c0_i32 = arith.constant 0 : i32
    %c0_i32_0 = arith.constant 0 : i32
    %c0_i32_1 = arith.constant 0 : i32
    return %c0_i32, %c0_i32_0 : i32, i32
  }
  func.func @transform_9(%arg0: i32, %arg1: i32) -> (i32, i32) {
    %c0_i32 = arith.constant 0 : i32
    %c0_i32_0 = arith.constant 0 : i32
    %c0_i32_1 = arith.constant 0 : i32
    return %c0_i32, %c0_i32_0 : i32, i32
  }
  func.func @transform_10(%arg0: i32, %arg1: i32) -> (i32, i32) {
    %c0_i32 = arith.constant 0 : i32
    %c0_i32_0 = arith.constant 0 : i32
    %c0_i32_1 = arith.constant 0 : i32
    return %c0_i32, %c0_i32_0 : i32, i32
  }
  func.func @transform_11(%arg0: i32, %arg1: i32) -> (i32, i32) {
    %c0_i32 = arith.constant 0 : i32
    %c0_i32_0 = arith.constant 0 : i32
    %c0_i32_1 = arith.constant 0 : i32
    return %c0_i32, %c0_i32_0 : i32, i32
  }
  func.func @transform_12(%arg0: i32, %arg1: i32) -> (i32, i32, i32, i32) {
    %c0_i32 = arith.constant 0 : i32
    %c0_i32_0 = arith.constant 0 : i32
    %c0_i32_1 = arith.constant 0 : i32
    return %arg0, %arg1, %c0_i32, %c0_i32_0 : i32, i32, i32, i32
  }
  func.func @transform_13(%arg0: i32, %arg1: i32) -> (i32, i32, i32) {
    %c0_i32 = arith.constant 0 : i32
    %c0_i32_0 = arith.constant 0 : i32
    return %arg0, %arg1, %c0_i32 : i32, i32, i32
  }
  func.func @transform_14(%arg0: i32, %arg1: i32) -> (i32, i32, i32) {
    %c0_i32 = arith.constant 0 : i32
    %c0_i32_0 = arith.constant 0 : i32
    return %arg0, %arg1, %c0_i32 : i32, i32, i32
  }
}

</mosaic_0001>

<bundles_post_ra>
// kernel: tpu_custom_call.1
= control target key start
LH: loop header
LB: loop body
LE: loop exit
PB: predicated region body
PF: predicated region fallthrough
CT: control target
= control target key end

     0   :  { %s3595_s0 = inlined_call_operand.hbm [shape: f32[2,8,32], index: 0, kind: input, shape index: {}]   ;;  %s3596_s1 = inlined_call_operand.hbm [shape: f32[2,8,8], index: 1, kind: input, shape index: {}]   ;;  %s3597_s2 = inlined_call_operand.hbm [shape: f32[2,8,8,16], index: 2, kind: input, shape index: {}]   ;;  %s3598_s3 = inlined_call_operand.hbm [shape: f32[2,8,8], index: 3, kind: input, shape index: {}]   ;;  %s3599_s4 = inlined_call_operand.hbm [shape: f32[32,32], index: 4, kind: input, shape index: {}]   ;;  %s3600_s5 = inlined_call_operand.hbm [shape: f32[8,32], index: 5, kind: input, shape index: {}]   ;;  %s3601_s6 = inlined_call_operand.hbm [shape: f32[16,32], index: 6, kind: input, shape index: {}]   ;;  %s3602_s7 = inlined_call_operand.hbm [shape: f32[1,32], index: 7, kind: input, shape index: {}]   ;;  %s3603_s8 = inlined_call_operand.hbm [shape: f32[8,32], index: 8, kind: input, shape index: {}]   ;;  %s3604_s9 = inlined_call_operand.hbm [shape: f32[1,32], index: 9, kind: input, shape index: {}]   ;;  %s3605_s10 = inlined_call_operand.hbm [shape: f32[16,32], index: 10, kind: input, shape index: {}]   ;;  %s3606_s11 = inlined_call_operand.hbm [shape: f32[1,32], index: 11, kind: input, shape index: {}]   ;;  %s3607_s12 = inlined_call_operand.hbm [shape: f32[2,8,8,32], index: 12, kind: output, shape index: {0}]   ;;  %s3608_s13 = inlined_call_operand.hbm [shape: f32[2,8,32], index: 13, kind: output, shape index: {1}]   ;;  %s3609_s14 = inlined_call_operand.hbm [shape: f32[2,8,8], index: 14, kind: output, shape index: {2}]  }
   0x1   :  { %3647 = sst [smem:[#allocation46_spill]] %s3595_s0 }
   0x2   :  { %3648 = sst [smem:[#allocation47_spill]] %s3596_s1 }
   0x3   :  { %3649 = sst [smem:[#allocation48_spill]] %s3597_s2 }
   0x4   :  { %3650 = sst [smem:[#allocation49_spill]] %s3598_s3 }
   0x5   :  { %3651 = sst [smem:[#allocation50_spill]] %s3599_s4 }
   0x6   :  { %3652 = sst [smem:[#allocation51_spill]] %s3600_s5 }
   0x7   :  { %3653 = sst [smem:[#allocation52_spill]] %s3602_s7 }
   0x8   :  { %3654 = sst [smem:[#allocation53_spill]] %s3604_s9 }
   0x9   :  { %3655 = sst [smem:[#allocation54_spill]] %s3607_s12 }
   0xa   :  { %3656 = sst [smem:[#allocation55_spill]] %s3608_s13 }
   0xb   :  { %3657 = sst [smem:[#allocation56_spill]] %s3609_s14 }
   0xc   :  { %20 = vsyncpa [#allocation3], 0 }
   0xd   :  { %22 = vsyncpa [#allocation3 + $0x1], 0 }
   0xe   :  { %23 = vsyncpa [#allocation6], 0 }
   0xf   :  { %25 = vsyncpa [#allocation6 + $0x1], 0 }
  0x10   :  { %26 = vsyncpa [#allocation9], 0 }
  0x11   :  { %28 = vsyncpa [#allocation9 + $0x1], 0 }
  0x12   :  { %29 = vsyncpa [#allocation12], 0 }
  0x13   :  { %30 = vsyncpa [#allocation15], 0 }
  0x14   :  { %31 = vsyncpa [#allocation18], 0 }
  0x15   :  { %32 = vsyncpa [#allocation21], 0 }
  0x16   :  { %33 = vsyncpa [#allocation4], 0 }
  0x17   :  { %35 = vsyncpa [#allocation4 + $0x1], 0 }
  0x18   :  { %36 = vsyncpa [#allocation24], 0 }
  0x19   :  { %38 = vsyncpa [#allocation24 + $0x1], 0  ;;  %s2843_s29 = smov 0   ;;  %s2845_s30 = smov 0  }
  0x1a   :  { %s2847_s15 = smov 0   ;;  %s2849_s16 = smov 0  }
  0x1b   :  { %s2851_s17 = smov 0   ;;  %s2853_s18 = smov 0  }
  0x1c LB: > { %3658 = sst [smem:[#allocation36_spill]] %s2723_s29  ;;  %s2874_s19 = sadd.s32 4294967295, %s2743_s18   ;;  %s2743_s18 = sphi %s2853_s18, %s44_s18   ;;  %s2739_s17 = sphi %s2851_s17, %s3729_s17   ;;  %s2735_s16 = sphi %s2849_s16, %s3728_s16   ;;  %s2731_s15 = sphi %s2847_s15, %s3724_s15   ;;  %s2727_s30 = sphi %s2845_s30, %s3727_s30   ;;  %s2723_s29 = sphi %s2843_s29, %s3726_s29  }
  0x1d   : > { %3659 = sst [smem:[#allocation37_spill]] %s2731_s15  ;;  %p1904_p0 = scmp.ge.s32.totalorder %s2743_s18, 1 }
  0x1e   : > { %3660 = sst [smem:[#allocation38_spill]] %s2735_s16  ;;  %p3618_p1 = scmp.eq.s32.totalorder %s2874_s19, 0 }
  0x1f   : > { %3661 = sst [smem:[#allocation39_spill]] %s2874_s19  ;;  %p425_p2 = scmp.lt.s32.totalorder %s2743_s18, 3 }
  0x20   : > { %s2745_s21 = smov [#allocation10]   ;;  %s2746_s24 = smov [#allocation11]  }
  0x21   : > { %p2879_p3 = pnand %p1904_p0, %p425_p2  ;;  %s437_s22 = sshll.u32 %s2745_s21, 4  ;;  %s2883_s22 = int_to_ptr.vmem [resolvable:$true] %s437_s22 }
  0x22   : > { %s451_s25 = sshll.u32 %s2746_s24, 4  ;;  %s2747_s26 = smov [#allocation14]   ;;  %s2894_s25 = int_to_ptr.vmem [resolvable:$true] %s451_s25 }
  0x23   : > { %s3662_s20 = scalar_select %p2879_p3, 1, 0 }
  0x24   : > { %p2095_p4 = pneg %p2879_p3  ;;  %s2896_s27 = sshll.u32 %s2747_s26, 4  ;;  %s476_s27 = int_to_ptr.vmem [resolvable:$true] %s2896_s27 }
  0x25   : > { %3663 = sst [smem:[#allocation40_spill]] %s3662_s20  ;;  %s3665_s4 = sld [smem:[#allocation50_spill]] }
  0x26   : > { %p2890_p6 = pnand %p2095_p4, %p3618_p1 }
  0x28   : > { %s3664_s23 = scalar_select %p2890_p6, 1, 0 }
  0x29   : > { %p2906_p8 = pneg %p2890_p6 }
  0x2b   : > { %s2229_s14 = scalar_lea.hbm %s3665_s4, 512 }
  0x2c   : > { %p2230_p7 = scmp.ne.s32.totalorder %s3665_s4, %s2229_s14  ;;  %p2236_p11 = scmp.lt.u32.totalorder %s2229_s14, %s3665_s4 }
  0x2d   : > { %s3666_s16 = scalar_select %p2906_p8, 1, 0 }
  0x2e   : > { %p2232_p9 = pnand %p2906_p8, %p2230_p7 }
  0x30   : > { %p2233_p10 = pneg %p2232_p9 }
  0x32   : > { %p2238_p12 = pnand %p2236_p11, %p2233_p10 }
  0x34   : > { %2241 = shalt.err (!%p2238_p12)
}
  0x35   : > { %s2242_s12 = scalar_lea.vmem %s2883_s22, 512  ;;  %p2250_p4 = scmp.lt.s32.totalorder %s2883_s22, %s2883_s22 }
  0x36   : > { %p2243_p13 = scmp.ne.s32.totalorder %s2883_s22, %s2242_s12  ;;  %p2251_p5 = scmp.lt.s32.totalorder %s2242_s12, %s2242_s12 }
  0x38   : > { %p2245_p0 = pnand %p2243_p13, %p2906_p8  ;;  %p2252_p7 = por %p2251_p5, %p2250_p4 }
  0x3a   : > { %p2246_p2 = pneg %p2245_p0 }
  0x3c   : > { %p2253_p9 = pnand %p2252_p7, %p2246_p2 }
  0x3e   : > { %2256 = shalt.err (!%p2253_p9)
}
  0x3f   : > { %s3621_s13 = smov 128   ;;  %s3623_s14 = smov 8  }
  0x40   : > { %2098 = dma.hbm_to_vmem [thread:$0]  (!%p2890_p6), %s3665_s4, 512, %s2883_s22, [#allocation9], %s3621_s13, %s3621_s13, %s3623_s14  }
  0x41   : > { %s3667_s5 = sld [smem:[#allocation51_spill]] }
  0x47   : > { %s2257_s12 = scalar_lea.hbm %s3667_s5, 128 }
  0x48   : > { %p2258_p5 = scmp.ne.s32.totalorder %s3667_s5, %s2257_s12  ;;  %p2264_p12 = scmp.lt.u32.totalorder %s2257_s12, %s3667_s5 }
  0x4a   : > { %p2260_p10 = pnand %p2258_p5, %p2906_p8 }
  0x4c   : > { %p2261_p11 = pneg %p2260_p10 }
  0x4e   : > { %p2266_p13 = pnand %p2264_p12, %p2261_p11 }
  0x50   : > { %2269 = shalt.err (!%p2266_p13)
}
  0x51   : > { %s2270_s22 = scalar_lea.vmem %s2894_s25, 128  ;;  %p2278_p7 = scmp.lt.s32.totalorder %s2894_s25, %s2894_s25 }
  0x52   : > { %p2271_p0 = scmp.ne.s32.totalorder %s2894_s25, %s2270_s22  ;;  %p2279_p9 = scmp.lt.s32.totalorder %s2270_s22, %s2270_s22 }
  0x54   : > { %p2273_p2 = pnand %p2271_p0, %p2906_p8  ;;  %p2280_p5 = por %p2279_p9, %p2278_p7 }
  0x56   : > { %p2274_p4 = pneg %p2273_p2 }
  0x58   : > { %p2281_p10 = pnand %p2280_p5, %p2274_p4 }
  0x5a   : > { %2284 = shalt.err (!%p2281_p10)
}
  0x5b   : > { %2101 = dma.hbm_to_vmem [thread:$0]  (!%p2890_p6), %s3667_s5, 128, %s2894_s25, [#allocation12]  }
  0x5c   : > { %s3668_s7 = sld [smem:[#allocation52_spill]] }
  0x62   : > { %s2285_s28 = scalar_lea.hbm %s3668_s7, 16 }
  0x63   : > { %p2286_p11 = scmp.ne.s32.totalorder %s3668_s7, %s2285_s28  ;;  %p2292_p0 = scmp.lt.u32.totalorder %s2285_s28, %s3668_s7 }
  0x65   : > { %p2288_p12 = pnand %p2286_p11, %p2906_p8 }
  0x67   : > { %p2289_p13 = pneg %p2288_p12 }
  0x69   : > { %p2294_p2 = pnand %p2292_p0, %p2289_p13 }
  0x6b   : > { %2297 = shalt.err (!%p2294_p2)
}
  0x6c   : > { %s2298_s22 = scalar_lea.vmem %s476_s27, 16  ;;  %s2305_s25 = scalar_lea.vmem %s476_s27, 32 }
  0x6d   : > { %p2299_p4 = scmp.ne.s32.totalorder %s476_s27, %s2298_s22  ;;  %p2306_p5 = scmp.lt.s32.totalorder %s476_s27, %s476_s27 }
  0x6e   : > { %p2307_p10 = scmp.lt.s32.totalorder %s2305_s25, %s2298_s22 }
  0x6f   : > { %p2301_p7 = pnand %p2299_p4, %p2906_p8 }
  0x70   : > { %p2308_p1 = por %p2307_p10, %p2306_p5 }
  0x71   : > { %p2302_p9 = pneg %p2301_p7 }
  0x73   : > { %p2309_p3 = pnand %p2308_p1, %p2302_p9 }
  0x75   : > { %2312 = shalt.err (!%p2309_p3)
}
  0x76   : > { %2107 = dma.hbm_to_vmem [thread:$0]  (!%p2890_p6), %s3668_s7, 16, %s476_s27, [#allocation15]  }
  0x77   : > { %s2750_s3 = smov [#allocation17]   ;;  %s3669_s9 = sld [smem:[#allocation53_spill]] }
  0x78   : > { %s497_s20 = sshll.u32 %s2750_s3, 4  ;;  %s498_s20 = int_to_ptr.vmem [resolvable:$true] %s497_s20 }
  0x7d   : > { %s2313_s24 = scalar_lea.hbm %s3669_s9, 16 }
  0x7e   : > { %p2314_p11 = scmp.ne.s32.totalorder %s3669_s9, %s2313_s24  ;;  %p2320_p12 = scmp.lt.u32.totalorder %s2313_s24, %s3669_s9 }
  0x80   : > { %p2316_p1 = pnand %p2314_p11, %p2906_p8 }
  0x82   : > { %p2317_p3 = pneg %p2316_p1 }
  0x84   : > { %p2322_p13 = pnand %p2320_p12, %p2317_p3 }
  0x86   : > { %2325 = shalt.err (!%p2322_p13)
}
  0x87   : > { %s2326_s27 = scalar_lea.vmem %s498_s20, 16  ;;  %s2333_s0 = scalar_lea.vmem %s498_s20, 32 }
  0x88   : > { %p2327_p0 = scmp.ne.s32.totalorder %s498_s20, %s2326_s27  ;;  %p2334_p7 = scmp.lt.s32.totalorder %s498_s20, %s498_s20 }
  0x89   : > { %p2335_p9 = scmp.lt.s32.totalorder %s2333_s0, %s2326_s27 }
  0x8a   : > { %p2329_p2 = pnand %p2327_p0, %p2906_p8 }
  0x8b   : > { %p2336_p5 = por %p2335_p9, %p2334_p7 }
  0x8c   : > { %p2330_p4 = pneg %p2329_p2 }
  0x8e   : > { %p2337_p10 = pnand %p2336_p5, %p2330_p4 }
  0x90   : > { %2340 = shalt.err (!%p2337_p10)
}
  0x91   : > { %2113 = dma.hbm_to_vmem [thread:$0]  (!%p2890_p6), %s3669_s9, 16, %s498_s20, [#allocation18]  }
  0x92   : > { %s3620_s28 = sadd.s32 4294967294, %s2743_s18   ;;  %s56_s21 = sadd.s32 1, %s2739_s17 }
  0x93   : > { %p58_p11 = scmp.ge.s32.totalorder %s56_s21, 2  ;;  %s65_s24 = sadd.s32 1, %s2731_s15 }
  0x94   : > { %p72_p1 = scmp.ne.s32.totalorder %s2731_s15, %s2727_s30  ;;  %p73_p3 = scmp.eq.s32.totalorder %s2743_s18, 0 }
  0x95   : > { %s3731_s21 = smov (%p58_p11, %s56_s21), 0  ;;  %p78_p13 = scmp.ne.s32.totalorder %s2727_s30, %s2723_s29 }
  0x96   : > { %3670 = sst [smem:[#allocation41_spill]] %s3731_s21  ;;  %p2998_p12 = por %p73_p3, %p72_p1 }
  0x97   : > { %s60_s20 = ssub.s32 %s2739_s17, %s3731_s21  ;;  %p356_p0 = scmp.eq.s32.totalorder %s2874_s19, 1 }
  0x98   : > { %p63_p2 = scmp.eq.s32.totalorder %s60_s20, 0  ;;  %p3672_p4 = scmp.eq.s32.totalorder %s2874_s19, 0 }
  0x99   : > { %p3013_p9 = por %p356_p0, %p72_p1  ;;  %p362_p5 = scmp.eq.s32.totalorder %s3620_s28, 1 }
  0x9a   : > { %p3009_p7 = por %p3672_p4, %p78_p13  ;;  %p2151_p11 = scmp.lt.s32.totalorder %s2743_s18, 2 }
  0x9b   : > { %s3675_s22 = scalar_select %p3013_p9, 1, 0 }
  0x9c   : > { %s3673_s12 = scalar_select %p3009_p7, 1, 0 }
  0x9d   : > { %3676 = sst [smem:[#allocation43_spill]] %s3675_s22  ;;  %p3022_p10 = por %p362_p5, %p78_p13 }
  0x9e   : > { %3674 = sst [smem:[#allocation42_spill]] %s3673_s12  ;;  %s3028_s0 = sand.u32 1, %s2731_s15  }
  0x9f   : > { %s3020_s25 = scalar_select %p63_p2, %s2731_s15, %s65_s24  }
  0xa0   : > { %s3678_s27 = scalar_select %p3022_p10, 1, 0 }
  0xa1   : > { %3677 = sst [smem:[#allocation44_spill]] %s3020_s25  ;;  %s3031_s2 = sshll.u32 %s2739_s17, 7 }
  0xa2   : > { %3679 = sst [smem:[#allocation45_spill]] %s3678_s27  ;;  %s3034_s3 = sshll.u32 %s3028_s0, 3 }
  0xa3   : > { %p3038_p1 = pnand %p2151_p11, %p2998_p12  ;;  %s3627_s24 = sand.u32 1, %s2743_s18  }
  0xa4   : > { %s3681_s1 = sld [smem:[#allocation47_spill]]  ;;  %s555_s4 = scalar_lea.vmem [#allocation5], %s3034_s3 }
  0xa5   : > { %s3680_s20 = scalar_select %p3038_p1, 1, 0 }
  0xa6   : > { %s563_s5 = sshll.u32 %s555_s4, 4  ;;  %s3055_s7 = scalar_lea.sflag [#allocation6], %s3627_s24  ;;  %s3050_s5 = int_to_ptr.vmem [resolvable:$true] %s563_s5 }
  0xa7   : > { %p3061_p12 = pneg %p3038_p1 }
  0xa9   : > { %s3682_s21 = scalar_select %p3061_p12, 1, 0 }
  0xaa   : > { %s3047_s14 = scalar_lea.hbm %s3681_s1, %s3031_s2  ;;  %s2346_s4 = scalar_lea.hbm %s3681_s1, 256 }
  0xab   : > { %s2341_s9 = scalar_lea.hbm %s3047_s14, 128  ;;  %p2347_p2 = scmp.lt.u32.totalorder %s3047_s14, %s3681_s1 }
  0xac   : > { %p2342_p3 = scmp.ne.s32.totalorder %s3047_s14, %s2341_s9  ;;  %p2348_p4 = scmp.lt.u32.totalorder %s2346_s4, %s2341_s9 }
  0xad   : > { %p2350_p11 = scmp.lt.u32.totalorder %s2341_s9, %s3047_s14 }
  0xae   : > { %p2344_p13 = pnand %p3061_p12, %p2342_p3  ;;  %p2349_p5 = por %p2348_p4, %p2347_p2 }
  0xb0   : > { %p2345_p0 = pneg %p2344_p13  ;;  %p2351_p10 = por %p2350_p11, %p2349_p5 }
  0xb2   : > { %p2352_p9 = pnand %p2351_p10, %p2345_p0 }
  0xb4   : > { %2355 = shalt.err (!%p2352_p9)
}
  0xb5   : > { %s2356_s24 = scalar_lea.vmem %s3050_s5, 128  ;;  %s2751_s13 = smov [#allocation5]  }
  0xb6   : > { %p2357_p3 = scmp.ne.s32.totalorder %s3050_s5, %s2356_s24  ;;  %s2361_s28 = sshll.u32 %s2751_s13, 4  ;;  %s2362_s28 = int_to_ptr.vmem [resolvable:$false] %s2361_s28 }
  0xb7   : > { %s2363_s25 = scalar_lea.vmem %s2362_s28, 256  ;;  %p2364_p6 = scmp.lt.s32.totalorder %s3050_s5, %s2362_s28 }
  0xb8   : > { %p2359_p13 = pnand %p2357_p3, %p3061_p12  ;;  %p2365_p8 = scmp.lt.s32.totalorder %s2363_s25, %s2356_s24 }
  0xba   : > { %p2360_p7 = pneg %p2359_p13  ;;  %p2366_p2 = por %p2365_p8, %p2364_p6 }
  0xbc   : > { %p2367_p4 = pnand %p2366_p2, %p2360_p7 }
  0xbe   : > { %2370 = shalt.err (!%p2367_p4)
}
  0xbf   : > { %2126 = dma.hbm_to_vmem [thread:$0]  (!%p3038_p1), %s3047_s14, 128, %s3050_s5, %s3055_s7  }
  0xc0   : > { %s3683_s9 = sshll.u32 %s3028_s0, 6  ;;  %s2752_s13 = smov [#allocation13]  }
  0xc1   : > { %s574_s26 = scalar_lea.vmem [#allocation7], %s3683_s9  ;;  %s461_s1 = sshll.u32 %s2752_s13, 4  ;;  %s462_s1 = int_to_ptr.vmem [resolvable:$true] %s461_s1 }
  0xc2   : > { %s583_s4 = sshll.u32 %s574_s26, 4  ;;  %s2371_s25 = scalar_lea.hbm %s3601_s6, 256  ;;  %s3087_s4 = int_to_ptr.vmem [resolvable:$true] %s583_s4 }
  0xc3   : > { %p2372_p6 = scmp.ne.s32.totalorder %s3601_s6, %s2371_s25  ;;  %p3684_p8 = scmp.ne.s32.totalorder %s3666_s16, 0 }
  0xc4   : > { %p2378_p10 = scmp.lt.u32.totalorder %s2371_s25, %s3601_s6 }
  0xc5   : > { %p2374_p7 = pnand %p2372_p6, %p3684_p8 }
  0xc7   : > { %p2375_p9 = pneg %p2374_p7 }
  0xc9   : > { %p2380_p0 = pnand %p2378_p10, %p2375_p9 }
  0xcb   : > { %2383 = shalt.err (!%p2380_p0)
}
  0xcc   : > { %s2384_s9 = scalar_lea.vmem %s462_s1, 256  ;;  %p2392_p13 = scmp.lt.s32.totalorder %s462_s1, %s462_s1 }
  0xcd   : > { %p2385_p5 = scmp.ne.s32.totalorder %s462_s1, %s2384_s9  ;;  %p2393_p2 = scmp.lt.s32.totalorder %s2384_s9, %s2384_s9 }
  0xcf   : > { %p2387_p11 = pnand %p2385_p5, %p3684_p8  ;;  %p2394_p4 = por %p2393_p2, %p2392_p13 }
  0xd1   : > { %p2388_p3 = pneg %p2387_p11 }
  0xd3   : > { %p2395_p1 = pnand %p2394_p4, %p2388_p3 }
  0xd5   : > { %2398 = shalt.err (!%p2395_p1)
}
  0xd6   : > { %p3685_p6 = scmp.ne.s32.totalorder %s3664_s23, 0  ;;  %s3686_s15 = smov 8  }
  0xd7   : > { %s3687_s27 = smov 128   ;;  %s2753_s24 = smov [#allocation16]  }
  0xd8   : > { %2104 = dma.hbm_to_vmem [thread:$0]  (!%p3685_p6), %s3601_s6, 256, %s462_s1, [#allocation12], %s3687_s27, %s3687_s27, %s3686_s15  }
  0xd9   : > { %s486_s28 = sshll.u32 %s2753_s24, 4  ;;  %s2754_s25 = smov [#allocation19]   ;;  %s487_s28 = int_to_ptr.vmem [resolvable:$true] %s486_s28 }
  0xda   : > { %s507_s5 = sshll.u32 %s2754_s25, 4  ;;  %s2399_s29 = scalar_lea.hbm %s3603_s8, 128  ;;  %s508_s5 = int_to_ptr.vmem [resolvable:$true] %s507_s5 }
  0xdb   : > { %p2400_p1 = scmp.ne.s32.totalorder %s3603_s8, %s2399_s29  ;;  %p2406_p10 = scmp.lt.u32.totalorder %s2399_s29, %s3603_s8 }
  0xdd   : > { %p2402_p7 = pnand %p2400_p1, %p3684_p8 }
  0xdf   : > { %p2403_p9 = pneg %p2402_p7 }
  0xe1   : > { %p2408_p0 = pnand %p2406_p10, %p2403_p9 }
  0xe3   : > { %2411 = shalt.err (!%p2408_p0)
}
  0xe4   : > { %s2412_s1 = scalar_lea.vmem %s487_s28, 128  ;;  %p2420_p13 = scmp.lt.s32.totalorder %s487_s28, %s487_s28 }
  0xe5   : > { %p2413_p5 = scmp.ne.s32.totalorder %s487_s28, %s2412_s1  ;;  %p2421_p2 = scmp.lt.s32.totalorder %s2412_s1, %s2412_s1 }
  0xe7   : > { %p2415_p11 = pnand %p2413_p5, %p3684_p8  ;;  %p2422_p4 = por %p2421_p2, %p2420_p13 }
  0xe9   : > { %p2416_p3 = pneg %p2415_p11 }
  0xeb   : > { %p2423_p12 = pnand %p2422_p4, %p2416_p3 }
  0xed   : > { %2426 = shalt.err (!%p2423_p12)
}
  0xee   : > { %2110 = dma.hbm_to_vmem [thread:$0]  (!%p3685_p6), %s3603_s8, 128, %s487_s28, [#allocation15]  }
  0xef   : > { %s2427_s13 = scalar_lea.hbm %s3605_s10, 256 }
  0xf0   : > { %p2428_p1 = scmp.ne.s32.totalorder %s3605_s10, %s2427_s13  ;;  %p2434_p12 = scmp.lt.u32.totalorder %s2427_s13, %s3605_s10 }
  0xf2   : > { %p2430_p7 = pnand %p2428_p1, %p3684_p8 }
  0xf4   : > { %p2431_p9 = pneg %p2430_p7 }
  0xf6   : > { %p2436_p10 = pnand %p2434_p12, %p2431_p9 }
  0xf8   : > { %2439 = shalt.err (!%p2436_p10)
}
  0xf9   : > { %s2440_s26 = scalar_lea.vmem %s508_s5, 256  ;;  %p2448_p3 = scmp.lt.s32.totalorder %s508_s5, %s508_s5 }
  0xfa   : > { %p2441_p0 = scmp.ne.s32.totalorder %s508_s5, %s2440_s26  ;;  %p2449_p13 = scmp.lt.s32.totalorder %s2440_s26, %s2440_s26 }
  0xfc   : > { %p2443_p5 = pnand %p2441_p0, %p3684_p8  ;;  %p2450_p2 = por %p2449_p13, %p2448_p3 }
  0xfe   : > { %p2444_p11 = pneg %p2443_p5 }
 0x100   : > { %p2451_p4 = pnand %p2450_p2, %p2444_p11 }
 0x102   : > { %2454 = shalt.err (!%p2451_p4)
}
 0x103   : > { %2116 = dma.hbm_to_vmem [thread:$0]  (!%p3685_p6), %s3605_s10, 256, %s508_s5, [#allocation18], %s3687_s27, %s3687_s27, %s3686_s15  }
 0x104   : > { %s2755_s19 = smov [#allocation20]   ;;  %s2455_s13 = scalar_lea.hbm %s3606_s11, 16 }
 0x105   : > { %s521_s22 = sshll.u32 %s2755_s19, 4  ;;  %p2456_p1 = scmp.ne.s32.totalorder %s3606_s11, %s2455_s13  ;;  %s522_s22 = int_to_ptr.vmem [resolvable:$true] %s521_s22 }
 0x106   : > { %p2462_p12 = scmp.lt.u32.totalorder %s2455_s13, %s3606_s11 }
 0x107   : > { %p2458_p7 = pnand %p2456_p1, %p3684_p8 }
 0x109   : > { %p2459_p9 = pneg %p2458_p7 }
 0x10b   : > { %p2464_p10 = pnand %p2462_p12, %p2459_p9 }
 0x10d   : > { %2467 = shalt.err (!%p2464_p10)
}
 0x10e   : > { %s2468_s5 = scalar_lea.vmem %s522_s22, 16  ;;  %s2475_s26 = scalar_lea.vmem %s522_s22, 32 }
 0x10f   : > { %p2469_p0 = scmp.ne.s32.totalorder %s522_s22, %s2468_s5  ;;  %p2476_p3 = scmp.lt.s32.totalorder %s522_s22, %s522_s22 }
 0x110   : > { %p2477_p13 = scmp.lt.s32.totalorder %s2475_s26, %s2468_s5 }
 0x111   : > { %p2471_p5 = pnand %p2469_p0, %p3684_p8 }
 0x112   : > { %p2478_p2 = por %p2477_p13, %p2476_p3 }
 0x113   : > { %p2472_p11 = pneg %p2471_p5 }
 0x115   : > { %p2479_p4 = pnand %p2478_p2, %p2472_p11 }
 0x117   : > { %2482 = shalt.err (!%p2479_p4)
}
 0x118   : > { %2119 = dma.hbm_to_vmem [thread:$0]  (!%p3685_p6), %s3606_s11, 16, %s522_s22, [#allocation21]  }
 0x119   : > { %s3688_s29 = sld [smem:[#allocation46_spill]]  ;;  %s536_s24 = scalar_lea.vmem [#allocation2], %s3034_s3 }
 0x11a   : > { %s544_s23 = sshll.u32 %s536_s24, 4  ;;  %s1963_s25 = sshll.u32 %s2739_s17, 10  ;;  %s3174_s23 = int_to_ptr.vmem [resolvable:$true] %s544_s23 }
 0x11b   : > { %s533_s14 = scalar_lea.sflag [#allocation3], %s3028_s0  ;;  %p3690_p1 = scmp.ne.s32.totalorder %s3682_s21, 0 }
 0x11f   : > { %s3689_s12 = smov %s3688_s29  ;;  %s3171_s13 = scalar_lea.hbm %s3688_s29, %s3031_s2 }
 0x120   : > { %s2483_s9 = scalar_lea.hbm %s3171_s13, 128  ;;  %s2488_s26 = scalar_lea.hbm %s3689_s12, 256 }
 0x121   : > { %p2484_p8 = scmp.ne.s32.totalorder %s3171_s13, %s2483_s9  ;;  %p2489_p9 = scmp.lt.u32.totalorder %s3171_s13, %s3689_s12 }
 0x122   : > { %p2490_p12 = scmp.lt.u32.totalorder %s2488_s26, %s2483_s9  ;;  %p2492_p0 = scmp.lt.u32.totalorder %s2483_s9, %s3171_s13 }
 0x123   : > { %p2486_p7 = pnand %p2484_p8, %p3690_p1 }
 0x124   : > { %p2491_p10 = por %p2490_p12, %p2489_p9 }
 0x125   : > { %p2487_p6 = pneg %p2486_p7 }
 0x126   : > { %p2493_p5 = por %p2492_p0, %p2491_p10 }
 0x128   : > { %p2494_p11 = pnand %p2493_p5, %p2487_p6 }
 0x12a   : > { %2497 = shalt.err (!%p2494_p11)
}
 0x12b   : > { %s2498_s0 = scalar_lea.vmem %s3174_s23, 128  ;;  %s2756_s16 = smov [#allocation2]  }
 0x12c   : > { %p2499_p3 = scmp.ne.s32.totalorder %s3174_s23, %s2498_s0  ;;  %s2503_s19 = sshll.u32 %s2756_s16, 4  ;;  %s2504_s19 = int_to_ptr.vmem [resolvable:$false] %s2503_s19 }
 0x12d   : > { %s2505_s29 = scalar_lea.vmem %s2504_s19, 256  ;;  %p2506_p4 = scmp.lt.s32.totalorder %s3174_s23, %s2504_s19 }
 0x12e   : > { %p2501_p13 = pnand %p2499_p3, %p3690_p1  ;;  %p2507_p8 = scmp.lt.s32.totalorder %s2505_s29, %s2498_s0 }
 0x130   : > { %p2502_p2 = pneg %p2501_p13  ;;  %p2508_p7 = por %p2507_p8, %p2506_p4 }
 0x132   : > { %p2509_p9 = pnand %p2508_p7, %p2502_p2 }
 0x134   : > { %2512 = shalt.err (!%p2509_p9)
}
 0x135   : > { %p3691_p6 = scmp.ne.s32.totalorder %s3680_s20, 0  ;;  %s3692_s22 = sld [smem:[#allocation48_spill]] }
 0x137   : > { %2123 = dma.hbm_to_vmem [thread:$0]  (!%p3691_p6), %s3171_s13, 128, %s3174_s23, %s533_s14  }
 0x13b   : > { %s3204_s5 = scalar_lea.hbm %s3692_s22, %s1963_s25  ;;  %s2518_s0 = scalar_lea.hbm %s3692_s22, 2048 }
 0x13c   : > { %s2513_s26 = scalar_lea.hbm %s3204_s5, 1024  ;;  %p2519_p5 = scmp.lt.u32.totalorder %s3204_s5, %s3692_s22 }
 0x13d   : > { %p2514_p12 = scmp.ne.s32.totalorder %s3204_s5, %s2513_s26  ;;  %p2520_p11 = scmp.lt.u32.totalorder %s2518_s0, %s2513_s26 }
 0x13e   : > { %p2522_p13 = scmp.lt.u32.totalorder %s2513_s26, %s3204_s5 }
 0x13f   : > { %p2516_p10 = pnand %p2514_p12, %p3690_p1  ;;  %p2521_p3 = por %p2520_p11, %p2519_p5 }
 0x141   : > { %p2517_p0 = pneg %p2516_p10  ;;  %p2523_p2 = por %p2522_p13, %p2521_p3 }
 0x143   : > { %p2524_p4 = pnand %p2523_p2, %p2517_p0 }
 0x145   : > { %2527 = shalt.err (!%p2524_p4)
}
 0x146   : > { %s2528_s25 = scalar_lea.vmem %s3087_s4, 1024  ;;  %s2757_s14 = smov [#allocation7]  }
 0x147   : > { %p2529_p8 = scmp.ne.s32.totalorder %s3087_s4, %s2528_s25  ;;  %s2533_s16 = sshll.u32 %s2757_s14, 4  ;;  %s2534_s16 = int_to_ptr.vmem [resolvable:$false] %s2533_s16 }
 0x148   : > { %s2535_s19 = scalar_lea.vmem %s2534_s16, 2048  ;;  %p2536_p12 = scmp.lt.s32.totalorder %s3087_s4, %s2534_s16 }
 0x149   : > { %p2531_p7 = pnand %p2529_p8, %p3690_p1  ;;  %p2537_p10 = scmp.lt.s32.totalorder %s2535_s19, %s2528_s25 }
 0x14b   : > { %p2532_p9 = pneg %p2531_p7  ;;  %p2538_p5 = por %p2537_p10, %p2536_p12 }
 0x14d   : > { %p2539_p11 = pnand %p2538_p5, %p2532_p9 }
 0x14f   : > { %2542 = shalt.err (!%p2539_p11)
}
 0x150   : > { %2129 = dma.hbm_to_vmem [thread:$0]  (!%p3691_p6), %s3204_s5, 1024, %s3087_s4, %s3055_s7, %s3687_s27, %s3687_s27, %s3686_s15  }
 0x151   : > { %s3693_s9 = sld [smem:[#allocation49_spill]]  ;;  %s597_s28 = scalar_lea.vmem [#allocation8], %s3034_s3 }
 0x152   : > { %s605_s1 = sshll.u32 %s597_s28, 4  ;;  %s3694_s0 = sand.u32 1, %s2743_s18   ;;  %s606_s1 = int_to_ptr.vmem [resolvable:$true] %s605_s1 }
 0x153   : > { %s594_s13 = scalar_lea.sflag [#allocation9], %s3694_s0 }
 0x157   : > { %s3235_s26 = scalar_lea.hbm %s3693_s9, %s3031_s2  ;;  %s2548_s15 = scalar_lea.hbm %s3693_s9, 256 }
 0x158   : > { %s2543_s23 = scalar_lea.hbm %s3235_s26, 128  ;;  %p2549_p2 = scmp.lt.u32.totalorder %s3235_s26, %s3693_s9 }
 0x159   : > { %p2544_p0 = scmp.ne.s32.totalorder %s3235_s26, %s2543_s23  ;;  %p2550_p4 = scmp.lt.u32.totalorder %s2548_s15, %s2543_s23 }
 0x15a   : > { %p2552_p7 = scmp.lt.u32.totalorder %s2543_s23, %s3235_s26 }
 0x15b   : > { %p2546_p3 = pnand %p2544_p0, %p3690_p1  ;;  %p2551_p8 = por %p2550_p4, %p2549_p2 }
 0x15d   : > { %p2547_p13 = pneg %p2546_p3  ;;  %p2553_p9 = por %p2552_p7, %p2551_p8 }
 0x15f   : > { %p2554_p12 = pnand %p2553_p9, %p2547_p13 }
 0x161   : > { %2557 = shalt.err (!%p2554_p12)
}
 0x162   : > { %s2558_s3 = scalar_lea.vmem %s606_s1, 128  ;;  %s2758_s5 = smov [#allocation8]  }
 0x163   : > { %p2559_p10 = scmp.ne.s32.totalorder %s606_s1, %s2558_s3  ;;  %s2563_s25 = sshll.u32 %s2758_s5, 4  ;;  %s2564_s25 = int_to_ptr.vmem [resolvable:$false] %s2563_s25 }
 0x164   : > { %s2565_s14 = scalar_lea.vmem %s2564_s25, 256  ;;  %p2566_p0 = scmp.lt.s32.totalorder %s606_s1, %s2564_s25 }
 0x165   : > { %p2561_p5 = pnand %p2559_p10, %p3690_p1  ;;  %p2567_p3 = scmp.lt.s32.totalorder %s2565_s14, %s2558_s3 }
 0x167   : > { %p2562_p11 = pneg %p2561_p5  ;;  %p2568_p6 = por %p2567_p3, %p2566_p0 }
 0x169   : > { %p2569_p2 = pnand %p2568_p6, %p2562_p11 }
 0x16b   : > { %2572 = shalt.err (!%p2569_p2)
}
 0x16c   : > { %p3695_p4 = scmp.ne.s32.totalorder %s3680_s20, 0  ;;  %s3696_s16 = sld [smem:[#allocation40_spill]] }
 0x16e   : > { %2132 = dma.hbm_to_vmem [thread:$0]  (!%p3695_p4), %s3235_s26, 128, %s606_s1, %s594_s13  }
 0x172   : > { %p3697_p13 = scmp.ne.s32.totalorder %s3696_s16, 0 }
 0x173   : > { %s3698_s21 = sld [smem:[#allocation42_spill]] (!%p3697_p13)  ;;  %s3260_s19 = sand.u32 (!%p3697_p13), 1, %s2727_s30  }
 0x174   : > { %614 = sbr.rel (%p3697_p13) target bundleno = 1515 (0x5eb), region = 68  ;;  %s3263_s29 = sshll.u32 (!%p3697_p13), %s3260_s19, 3 }
 0x175   : > { %s617_s24 = scalar_lea.sflag (!%p3697_p13), [#allocation3], %s3260_s19  ;;  %s620_s28 = scalar_lea.vmem (!%p3697_p13), [#allocation2], %s3263_s29 }
 0x179   : > { %p3699_p1 = scmp.ne.s32.totalorder (!%p3697_p13), %s3698_s21, 0 }
 0x17b   : > { %2682 = dma.done.wait (%p3699_p1), %s617_s24, 128  }
 0x17c   : > { %2684 = vsyncadd (%p3699_p1), %s617_s24, 4294967168  ;;  %s3700_s20 = sld [smem:[#allocation39_spill]]  ;;  %s629_s0 = scalar_lea.vmem [#allocation5], %s3263_s29 }
 0x182   : > { %s3272_s26 = sand.u32 1, %s3700_s20  }
 0x183   : > { %s626_s1 = scalar_lea.sflag [#allocation6], %s3272_s26 }
 0x184   : > { %2686 = dma.done.wait (%p3699_p1), %s626_s1, 1152  }
 0x185   : > { %2688 = vsyncadd (%p3699_p1), %s626_s1, 4294966144  ;;  %s1926_s13 = sshll.u32 %s3260_s19, 6  ;;  %s644_s7 = scalar_lea.sflag [#allocation9], %s3272_s26 }
 0x186   : > { %s3283_s23 = scalar_lea.vmem [#allocation7], %s1926_s13  ;;  %s647_s4 = scalar_lea.vmem [#allocation8], %s3263_s29 }
 0x187   : > { %2690 = dma.done.wait (%p3699_p1), %s644_s7, 128  }
 0x188   : > { %2692 = vsyncadd (%p3699_p1), %s644_s7, 4294967168  ;;  %p3701_p6 = scmp.eq.s32.totalorder %s3700_s20, 0 }
 0x18a   : > { %2694 = dma.done.wait (%p3701_p6), [#allocation9], 512   ;;  %p3702_p8 = pmov %p3701_p6 }
 0x18b   : > { %p3703_p7 = pmov %p3701_p6 }
 0x18c   : > { %2696 = vsyncadd (%p3702_p8), [#allocation9], 4294966784 }
 0x18d   : > { %2698 = dma.done.wait (%p3703_p7), [#allocation12], 384   ;;  %p3704_p9 = pmov %p3701_p6 }
 0x18e   : > { %p3705_p12 = pmov %p3701_p6 }
 0x18f   : > { %2700 = vsyncadd (%p3704_p9), [#allocation12], 4294966912 }
 0x190   : > { %2702 = dma.done.wait (%p3705_p12), [#allocation15], 144   ;;  %p3706_p10 = pmov %p3701_p6 }
 0x191   : > { %p3707_p5 = pmov %p3701_p6 }
 0x192   : > { %2704 = vsyncadd (%p3706_p10), [#allocation15], 4294967152 }
 0x193   : > { %2706 = dma.done.wait (%p3707_p5), [#allocation18], 272   ;;  %p3708_p11 = pmov %p3707_p5 }
 0x194   : > { %p3709_p0 = pmov %p3707_p5 }
 0x195   : > { %2708 = vsyncadd (%p3708_p11), [#allocation18], 4294967024 }
 0x196   : > { %2710 = dma.done.wait (%p3709_p0), [#allocation21], 16   ;;  %p3710_p3 = pmov %p3709_p0 }
 0x197   : > { %v2759_v0 = vmov 0.0|0.0   ;;  %v2760_v1 = vmov 0.0   ;;  %vm2761_vm0 = vmmov 0   ;;  %vm767_vm1 = vcmask 64512   ;;  %v762_v2 = vld [vmem:[#allocation10] sm:$0xff]  ;;  %v763_v3 = vld [vmem:[#allocation10 + $0x8] sm:$0xff] }
 0x198   : > { %2712 = vsyncadd (%p3710_p3), [#allocation21], 4294967280  ;;  %2031 = vmatprep.subr.bf16.mxu1 %v2759_v0  ;;  %1987 = vmatprep.subr.mxu0 %v2760_v1  ;;  %v766_v4 = vld [vmem:[#allocation11] sm:$0xff]  ;;  %v2032_v5 = vpack.c.bf16 %v763_v3, %v762_v2  ;;  %v764_v7 = vld [vmem:[#allocation10 + $0x10] sm:$0xff]  ;;  %vm925_vm2 = vcmask 130048   ;;  %vm841_vm3 = vcmask 261120   ;;  %v1060_v26 = vlaneseq }
 0x199   : > { %1989 = vmatprep.mubr.msk.f32.mxu0 %vm2761_vm0, %v2760_v1  ;;  %2000 = vmatprep.mubr.msk.f32.mxu1 %vm2761_vm0, %v2760_v1  ;;  %v3319_v6 = vld [vmem:[%s629_s0] sm:$0xff]  ;;  %v765_v8 = vld [vmem:[#allocation10 + $0x18] sm:$0xff]  ;;  %v924_v10 = vld [vmem:[#allocation13 + $0x8] sm:$0xff]  ;;  %v2762_v24 = vmov 1966171168   ;;  %s3386_s15 = scalar_lea.vmem [#allocation22], %s1926_s13 }
 0x19a   : > { %1988 = vmatpush3.msra.mxu0 %v766_v4  ;;  %v923_v9 = vld [vmem:[#allocation13] sm:$0xff]  ;;  %2033 = vmatpush3.bf16.msra.mxu1 %v2032_v5  ;;  %v2035_v11 = vpack.c.bf16 %v765_v8, %v764_v7  ;;  %v3324_v13 = vld [vmem:[%s3283_s23] sm:$0xff]  ;;  %v3330_v14 = vld [vmem:[%s3283_s23 + $0x8] sm:$0xff]  ;;  %v1058_v25 = vunpack.c.l.s4 %v2762_v24  ;;  %v3374_v28 = vshrl.u32 %v1060_v26, 7  ;;  %vm1228_vm4 = vcmask 1041409   ;;  %s748_s2 = scalar_lea.vmem [#allocation25], %s3263_s29 }
 0x19b   : > { %1990 = vmatmul.mubr.msk.f32.vlgmr.msra.gmra.mrb[0].mxu0 %vm767_vm1, %v3319_v6  ;;  %v2037_v12 = vpack.c.bf16 %v924_v10, %v923_v9  ;;  %2034 = vmatprep.subr.bf16.mxu1 %v2759_v0  ;;  %v3334_v15 = vld [vmem:[%s620_s28] sm:$0xff]  ;;  %v3337_v16 = vld [vmem:[%s3283_s23 + $0x10] sm:$0xff]  ;;  %v3347_v17 = vld [vmem:[%s3283_s23 + $0x18] sm:$0xff]  ;;  %vm1230_vm5 = vcmask 1042434   ;;  %vm1232_vm6 = vcmask 1043459   ;;  %vm1234_vm7 = vcmask 1044484  }
 0x19c   : > { %2007 = vmatprep.mubr.msk.f32.mxu0 %vm925_vm2, %v3324_v13  ;;  %v3350_v18 = vld [vmem:[%s3283_s23 + $0x20] sm:$0xff]  ;;  %v3359_v19 = vld [vmem:[%s3283_s23 + $0x28] sm:$0xff]  ;;  %v3362_v20 = vld [vmem:[%s3283_s23 + $0x30] sm:$0xff]  ;;  %v1059_v27 = vunpack.c.0.s8 %v1058_v25  ;;  %v3378_v41 = vsub.s32 0, %v3374_v28  ;;  %vm1236_vm8 = vcmask 1045509   ;;  %vm1238_vm9 = vcmask 1046534  }
 0x19d   : > { %2038 = vmatprep.subr.bf16.mxu0 %v2037_v12  ;;  %v3369_v21 = vld [vmem:[%s3283_s23 + $0x38] sm:$0xff]  ;;  %v1941_v31 = vld [vmem:[#allocation14] ss:$0 sm:$0xff]  ;;  %vm1240_vm10 = vcmask 1047559   ;;  %s3711_s27 = sld [smem:[#allocation38_spill]]  ;;  %s3712_s3 = sld [smem:[#allocation43_spill]] }
 0x19e   : > { %2040 = vmatpush3.bf16.msra.mxu0 %v2037_v12  ;;  %2036 = vmatpush3.bf16.msra.mxu1 %v2035_v11  ;;  %v1062_v34 = vsub.s32 %v1059_v27, %v3374_v28  ;;  %s3713_s16 = sld [smem:[#allocation54_spill]]  ;;  %s1579_s28 = sshll.u32 %s3386_s15, 4  ;;  %s3477_s28 = int_to_ptr.vmem [resolvable:$true] %s1579_s28 }
 0x19f   : > { %2019 = vmatprep.subr.mxu1 %v2760_v1  ;;  %s1554_s20 = scalar_lea.sflag [#allocation4], %s3260_s19  ;;  %s2573_s1 = scalar_lea.vmem %s3477_s28, 1024 }
 0x1a0   : > { %p2574_p2 = scmp.ne.s32.totalorder %s3477_s28, %s2573_s1  ;;  %s2763_s0 = smov [#allocation22]  }
 0x1a1   : > { %2008 = vmatmul.mubr.msk.f32.vlgmr.msra.gmra.mrb[2].mxu0 %vm925_vm2, %v3330_v14  ;;  %2001 = vmatmul.mubr.msk.f32.vlgmr.msra.gmra.mrb[0].mxu1 %vm841_vm3, %v3334_v15  ;;  %s2577_s13 = sshll.u32 %s2763_s0, 4  ;;  %s2578_s13 = int_to_ptr.vmem [resolvable:$false] %s2577_s13 }
 0x1a2   : > { %2010 = vmatprep.mubr.msk.f32.mxu0 %vm925_vm2, %v3337_v16  ;;  %2021 = vmatprep.mubr.msk.f32.mxu1 %vm2761_vm0, %v2760_v1  ;;  %s2579_s23 = scalar_lea.vmem %s2578_s13, 2048  ;;  %p2580_p6 = scmp.lt.s32.totalorder %s3477_s28, %s2578_s13 }
 0x1a3   : > { %s1964_s5 = sshll.u32 %s3711_s27, 10  ;;  %p3715_p4 = scmp.ne.s32.totalorder %s3712_s3, 0 }
 0x1a4   : > { %s3714_s21 = smov %s3713_s16  ;;  %s3474_s24 = scalar_lea.hbm %s3713_s16, %s1964_s5 }
 0x1a5   : > { %2011 = vmatmul.mubr.msk.f32.gmra.mrb[4].mxu0 %vm925_vm2, %v3347_v17  ;;  %p2575_p13 = pnand %p2574_p2, %p3715_p4  ;;  %p2581_p8 = scmp.lt.s32.totalorder %s2579_s23, %s2573_s1 }
 0x1a6   : > { %2013 = vmatprep.mubr.msk.f32.mxu0 %vm925_vm2, %v3350_v18 }
 0x1a7   : > { %p2576_p1 = pneg %p2575_p13  ;;  %p2582_p7 = por %p2581_p8, %p2580_p6 }
 0x1a9   : > { %2014 = vmatmul.mubr.msk.f32.gmra.mrb[6].mxu0 %vm925_vm2, %v3359_v19  ;;  %p2583_p9 = pnand %p2582_p7, %p2576_p1 }
 0x1aa   : > { %2016 = vmatprep.mubr.msk.f32.mxu0 %vm925_vm2, %v3362_v20 }
 0x1ad   : > { %2017 = vmatmul.mubr.msk.f32.gmra.mrb[8].mxu0 %vm925_vm2, %v3369_v21 }
 0x26e   : > { %v837_v22 = vpop.f32.mrb[0].mxu0 }
 0x26f   : > { %v1991_v23 = vpop.f32.mrb[1].mxu0 }
 0x274   : > { %v2009_v29 = vpop.f32.mrb[2].mxu0  ;;  %v911_v30 = vpop.f32.mrb[0].mxu1 }
 0x275   : > { %v1016_v32 = vpop.f32.mrb[3].mxu0  ;;  %v912_v33 = vadd.f32 %v911_v30, %v837_v22  ;;  %v2002_v35 = vpop.f32.mrb[1].mxu1 }
 0x277   : > { %v922_v36 = vadd.f32 %v1941_v31, %v912_v33  ;;  %v1195_v31 = vand.u32 127, %v1060_v26 }
 0x278   : > { %v2012_v37 = vpop.f32.mrb[4].mxu0 }
 0x279   : > { %v1026_v38 = vpop.f32.mrb[5].mxu0  ;;  %v1056_v39 = vcombine.high %v922_v36, %v922_v36  ;;  %v1063_v40 = vrot.slane %v922_v36, %v1062_v34  ;;  %v1198_v33 = vsub.s32 %v1195_v31, %v3374_v28 }
 0x27b   : > { %v1070_v42 = vrot.slane %v1056_v39, %v1062_v34  ;;  %v1071_v43 = vcombine.high %v1063_v40, %v1063_v40  ;;  %v1079_v44 = vrot.slane %v1063_v40, %v1062_v34 }
 0x27c   : > { %v2015_v45 = vpop.f32.mrb[6].mxu0 }
 0x27d   : > { %v1036_v46 = vpop.f32.mrb[7].mxu0  ;;  %v1093_v47 = vrot.slane %v1071_v43, %v1062_v34  ;;  %v1108_v48 = vrot.slane %v1079_v44, %v3378_v41  ;;  %v1101_v49 = vcombine.high %v1079_v44, %v1079_v44  ;;  %v1072_v50 = vcombine.high %v1070_v42, %v1070_v42 }
 0x27e   : > { %v1086_v51 = vrot.slane %v1070_v42, %v1062_v34 }
 0x27f   : > { %v1112_v52 = vrot.slane %v1093_v47, %v3378_v41  ;;  %v1145_v53 = vadd.f32 %v1108_v48, %v1016_v32  ;;  %v1103_v54 = vcombine.high %v1093_v47, %v1093_v47  ;;  %v1116_v55 = vrot.slane %v1101_v49, %v3378_v41 }
 0x280   : > { %v2018_v56 = vpop.f32.mrb[8].mxu0  ;;  %v1100_v57 = vrot.slane %v1072_v50, %v1062_v34  ;;  %v1124_v58 = vrot.slane %v1086_v51, %v3378_v41  ;;  %v1102_v60 = vcombine.high %v1086_v51, %v1086_v51  ;;  %v761_v50 = vld [vmem:[%s647_s4] sm:$0xff] }
 0x281   : > { %v1046_v59 = vpop.f32.mrb[9].mxu0  ;;  %v1146_v61 = vadd.f32 %v2009_v29, %v1112_v52  ;;  %1153 = vst.msk [vmem:[%s3386_s15] sm:$0xff] %vm841_vm3, %v1145_v53  ;;  %v1120_v62 = vrot.slane %v1103_v54, %v3378_v41  ;;  %v1147_v63 = vadd.f32 %v1116_v55, %v1026_v38  ;;  %v1161_v2 = vsel %vm841_vm3, %v1145_v53, 0.0 }
 0x282   : > { %v1128_v3 = vrot.slane %v1100_v57, %v3378_v41  ;;  %v1149_v4 = vadd.f32 %v1124_v58, %v1036_v46  ;;  %v1104_v5 = vcombine.high %v1100_v57, %v1100_v57  ;;  %v1132_v7 = vrot.slane %v1102_v60, %v3378_v41  ;;  %1162 = vadd.xlane.f32.xlu0 %v1161_v2 }
 0x283   : > { %1154 = vst.msk [vmem:[%s3386_s15 + $0x8] sm:$0xff] %vm841_vm3, %v1146_v61  ;;  %v1148_v8 = vadd.f32 %v2012_v37, %v1120_v62  ;;  %1155 = vst.msk [vmem:[%s3386_s15 + $0x10] sm:$0xff] %vm841_vm3, %v1147_v63  ;;  %v1167_v9 = vsel %vm841_vm3, %v1147_v63, 0.0  ;;  %v1164_v22 = vsel %vm841_vm3, %v1146_v61, 0.0  ;;  %vm1185_vm11 = vcmp.eq.f32.partialorder %v761_v50, 0.0 }
 0x284   : > { %v1150_v10 = vadd.f32 %v2015_v45, %v1128_v3  ;;  %1157 = vst.msk [vmem:[%s3386_s15 + $0x20] sm:$0xff] %vm841_vm3, %v1149_v4  ;;  %v1136_v11 = vrot.slane %v1104_v5, %v3378_v41  ;;  %v1151_v12 = vadd.f32 %v1132_v7, %v1046_v59  ;;  %1168 = vadd.xlane.f32.xlu1 %v1167_v9  ;;  %v1173_v25 = vsel %vm841_vm3, %v1149_v4, 0.0 }
 0x285   : > { %1156 = vst.msk [vmem:[%s3386_s15 + $0x18] sm:$0xff] %vm841_vm3, %v1148_v8  ;;  %v1170_v24 = vsel %vm841_vm3, %v1148_v8, 0.0  ;;  %v1265_v3 = vsub.s32 1, %v3374_v28  ;;  %v1272_v9 = vsub.s32 2, %v3374_v28 }
 0x286   : > { %1158 = vst.msk [vmem:[%s3386_s15 + $0x28] sm:$0xff] %vm841_vm3, %v1150_v10  ;;  %v1152_v23 = vadd.f32 %v2018_v56, %v1136_v11  ;;  %1159 = vst.msk [vmem:[%s3386_s15 + $0x30] sm:$0xff] %vm841_vm3, %v1151_v12  ;;  %1165 = vadd.xlane.f32.xlu0 %v1164_v22  ;;  %v1176_v27 = vsel %vm841_vm3, %v1150_v10, 0.0  ;;  %v1179_v29 = vsel %vm841_vm3, %v1151_v12, 0.0  ;;  %v1286_v10 = vsub.s32 4, %v3374_v28 }
 0x287   : > { %v1279_v22 = vsub.s32 3, %v3374_v28 }
 0x288   : > { %1160 = vst.msk [vmem:[%s3386_s15 + $0x38] sm:$0xff] %vm841_vm3, %v1152_v23  ;;  %1171 = vadd.xlane.f32.xlu1 %v1170_v24  ;;  %v1182_v30 = vsel %vm841_vm3, %v1152_v23, 0.0  ;;  %v1300_v23 = vsub.s32 6, %v3374_v28 }
 0x28a   : > { %1174 = vadd.xlane.f32.xlu0 %v1173_v25  ;;  %v1293_v25 = vsub.s32 5, %v3374_v28 }
 0x28c   : > { %1177 = vadd.xlane.f32.xlu1 %v1176_v27 }
 0x28e   : > { %1180 = vadd.xlane.f32.xlu0 %v1179_v29  ;;  %v1307_v29 = vsub.s32 7, %v3374_v28 }
 0x290   : > { %1183 = vadd.xlane.f32.xlu1 %v1182_v30  ;;  %v1376_v30 = vld [vmem:[#allocation16] sm:$0xff] }
 0x291   : > { %2020 = vmatpush3.msra.mxu1 %v1376_v30 }
 0x292   : > { %2041 = vmatprep.subr.bf16.mxu1 %v2759_v0  ;;  %2022 = vmatmul.mubr.msk.f32.vlgmr.msra.gmra.mrb[2].mxu1 %vm767_vm1, %v3319_v6 }
 0x293   : > { %2028 = vmatprep.mubr.msk.f32.mxu1 %vm2761_vm0, %v2760_v1 }
 0x30f   : > { %v1163_v32 = vpop.xlane.xlu0 %1162 }
 0x310   : > { %v1199_v36 = vrot.slane %v1163_v32, %v1198_v33  ;;  %v1454_v32 = vld [vmem:[#allocation19] sm:$0xff] }
 0x311   : > { %v1169_v34 = vpop.xlane.xlu1 %1168 }
 0x312   : > { %v1207_v38 = vrot.slane %v1169_v34, %v1198_v33 }
 0x313   : > { %v1166_v35 = vpop.xlane.xlu0 %1165 }
 0x314   : > { %v1203_v37 = vrot.slane %v1166_v35, %v1198_v33 }
 0x315   : > { %v1172_v39 = vpop.xlane.xlu1 %1171 }
 0x316   : > { %v1229_v40 = vsel %vm1228_vm4, %v1203_v37, %v1199_v36  ;;  %v1211_v42 = vrot.slane %v1172_v39, %v1198_v33 }
 0x317   : > { %v1231_v43 = vsel %vm1230_vm5, %v1207_v38, %v1229_v40  ;;  %v1175_v26 = vpop.xlane.xlu0 %1174 }
 0x318   : > { %v1233_v44 = vsel %vm1232_vm6, %v1211_v42, %v1231_v43  ;;  %v1215_v45 = vrot.slane %v1175_v26, %v1198_v33 }
 0x319   : > { %v1178_v46 = vpop.xlane.xlu1 %1177 }
 0x31a   : > { %v1235_v47 = vsel %vm1234_vm7, %v1215_v45, %v1233_v44  ;;  %v1219_v48 = vrot.slane %v1178_v46, %v1198_v33 }
 0x31b   : > { %v1181_v49 = vpop.xlane.xlu0 %1180 }
 0x31c   : > { %v1237_v51 = vsel %vm1236_vm8, %v1219_v48, %v1235_v47  ;;  %v1223_v52 = vrot.slane %v1181_v49, %v1198_v33 }
 0x31d   : > { %v1184_v53 = vpop.xlane.xlu1 %1183 }
 0x31e   : > { %v1227_v54 = vrot.slane %v1184_v53, %v1198_v33  ;;  %v1239_v55 = vsel %vm1238_vm9, %v1223_v52, %v1237_v51  ;;  %v1455_v33 = vld [vmem:[#allocation19 + $0x8] sm:$0xff] }
 0x31f   : > { %v2042_v34 = vpack.c.bf16 %v1455_v33, %v1454_v32 }
 0x320   : > { %v1241_v56 = vsel %vm1240_vm10, %v1227_v54, %v1239_v55 }
 0x321   : > { %v1243_v57 = vsel %vm1185_vm11, -1e+30, %v1241_v56  ;;  %2043 = vmatpush3.bf16.msra.mxu1 %v2042_v34 }
 0x322   : > { %v1244_v58 = vsel %vm767_vm1, %v1243_v57, -inf }
 0x323   : > { %1245 = vmax.xlane.f32.xlu0 %v1244_v58 }
 0x3b0   : > { %v1246_v59 = vpop.xlane.xlu0 %1245 }
 0x3b1   : > { %v1247_v60 = vsub.f32 %v1243_v57, %v1246_v59 }
 0x3b3   : > { %v1248_v61 = vmul.f32 1.442695, %v1247_v60 }
 0x3b5   : > { %2225 = vpow2.f32 %v1248_v61 }
 0x3bf   : > { %v2226_v62 = vpop.eup %2225 }
 0x3c0   : > { %v1250_v63 = vsel %vm767_vm1, %v2226_v62, 0.0 }
 0x3c1   : > { %1251 = vadd.xlane.f32.xlu1 %v1250_v63 }
 0x44e   : > { %v1252_v2 = vpop.xlane.xlu1 %1251 }
 0x44f   : > { %2227 = vrcp.f32 %v1252_v2 }
 0x459   : > { %v2228_v4 = vpop.eup %2227 }
 0x45a   : > { %v1254_v5 = vmul.f32 %v2228_v4, %v2226_v62 }
 0x45c   : > { %v1266_v7 = vrot.slane %v1254_v5, %v1265_v3  ;;  %v1259_v8 = vrot.slane %v1254_v5, %v3378_v41  ;;  %1255 = vst.msk [vmem:[%s748_s2] sm:$0xff] %vm767_vm1, %v1254_v5  ;;  %v1273_v11 = vrot.slane %v1254_v5, %v1272_v9  ;;  %v1287_v12 = vrot.slane %v1254_v5, %v1286_v10 }
 0x45d   : > { %v1280_v24 = vrot.slane %v1254_v5, %v1279_v22  ;;  %v1301_v41 = vrot.slane %v1254_v5, %v1300_v23  ;;  %v1294_v27 = vrot.slane %v1254_v5, %v1293_v25  ;;  %v1308_v31 = vrot.slane %v1254_v5, %v1307_v29 }
 0x45e   : > { %1268 = vbcast.lane.b32.xlu1 %v1266_v7, 256  ;;  %1261 = vbcast.lane.b32.xlu0 %v1259_v8, 256 }
 0x462   : > { %1275 = vbcast.lane.b32.xlu1 %v1273_v11, 256  ;;  %1289 = vbcast.lane.b32.xlu0 %v1287_v12, 256 }
 0x466   : > { %1282 = vbcast.lane.b32.xlu1 %v1280_v24, 256  ;;  %1303 = vbcast.lane.b32.xlu0 %v1301_v41, 256 }
 0x46a   : > { %1296 = vbcast.lane.b32.xlu1 %v1294_v27, 256 }
 0x46e   : > { %1310 = vbcast.lane.b32.xlu1 %v1308_v31, 256 }
 0x4d0   : > { %v1269_v35 = vpop.permute.xlu1 %1268  ;;  %v1262_v36 = vpop.permute.xlu0 %1261 }
 0x4d1   : > { %v1313_v28 = vmul.f32 %v1269_v35, %v3330_v14  ;;  %v1312_v37 = vmul.f32 %v1262_v36, %v3324_v13 }
 0x4d3   : > { %v1327_v0 = vsel %vm925_vm2, %v1313_v28, 0.0  ;;  %v1320_v38 = vsel %vm925_vm2, %v1312_v37, 0.0 }
 0x4d4   : > { %v1328_v6 = vrot.slane %v1327_v0, 4  ;;  %v1321_v39 = vrot.slane %v1320_v38, 4  ;;  %v1276_v40 = vpop.permute.xlu1 %1275  ;;  %v1290_v42 = vpop.permute.xlu0 %1289 }
 0x4d5   : > { %v1314_v43 = vmul.f32 %v1276_v40, %v3337_v16  ;;  %v1316_v1 = vmul.f32 %v1290_v42, %v3350_v18 }
 0x4d6   : > { %v1329_v26 = vadd.f32 %v1328_v6, %v1327_v0  ;;  %v1322_v44 = vadd.f32 %v1321_v39, %v1320_v38 }
 0x4d7   : > { %v1334_v45 = vsel %vm925_vm2, %v1314_v43, 0.0  ;;  %v1348_v14 = vsel %vm925_vm2, %v1316_v1, 0.0 }
 0x4d8   : > { %v1330_v46 = vrot.slane %v1329_v26, 2  ;;  %v1323_v13 = vrot.slane %v1322_v44, 2  ;;  %v1335_v47 = vrot.slane %v1334_v45, 4  ;;  %v1349_v48 = vrot.slane %v1348_v14, 4  ;;  %v1283_v49 = vpop.permute.xlu1 %1282  ;;  %v1304_v50 = vpop.permute.xlu0 %1303 }
 0x4d9   : > { %v1315_v51 = vmul.f32 %v1283_v49, %v3347_v17  ;;  %v1318_v52 = vmul.f32 %v1304_v50, %v3362_v20 }
 0x4da   : > { %v1331_v53 = vadd.f32 %v1330_v46, %v1329_v26  ;;  %v1336_v16 = vadd.f32 %v1335_v47, %v1334_v45  ;;  %v1350_v54 = vadd.f32 %v1349_v48, %v1348_v14  ;;  %v1324_v18 = vadd.f32 %v1323_v13, %v1322_v44 }
 0x4db   : > { %v1341_v55 = vsel %vm925_vm2, %v1315_v51, 0.0  ;;  %v1362_v56 = vsel %vm925_vm2, %v1318_v52, 0.0 }
 0x4dc   : > { %v1337_v57 = vrot.slane %v1336_v16, 2  ;;  %v1297_v58 = vpop.permute.xlu1 %1296  ;;  %v1351_v59 = vrot.slane %v1350_v54, 2  ;;  %v1342_v60 = vrot.slane %v1341_v55, 4  ;;  %v1363_v61 = vrot.slane %v1362_v56, 4 }
 0x4dd   : > { %v1317_v62 = vmul.f32 %v1297_v58, %v3359_v19  ;;  %v1332_v63 = vrot.slane %v1331_v53, 1  ;;  %v1325_v17 = vrot.slane %v1324_v18, 1 }
 0x4de   : > { %v1338_v2 = vadd.f32 %v1337_v57, %v1336_v16  ;;  %v1343_v3 = vadd.f32 %v1342_v60, %v1341_v55  ;;  %v1364_v20 = vadd.f32 %v1363_v61, %v1362_v56  ;;  %v1352_v9 = vadd.f32 %v1351_v59, %v1350_v54 }
 0x4df   : > { %v1355_v4 = vsel %vm925_vm2, %v1317_v62, 0.0  ;;  %v1333_v23 = vadd.f32 %v1332_v63, %v1331_v53  ;;  %v1326_v24 = vadd.f32 %v1325_v17, %v1324_v18 }
 0x4e0   : > { %v1339_v5 = vrot.slane %v1338_v2, 1  ;;  %v1356_v7 = vrot.slane %v1355_v4, 4  ;;  %v1311_v8 = vpop.permute.xlu1 %1310  ;;  %v1344_v10 = vrot.slane %v1343_v3, 2  ;;  %v1365_v11 = vrot.slane %v1364_v20, 2 }
 0x4e1   : > { %v1319_v12 = vmul.f32 %v1311_v8, %v3369_v21  ;;  %v1353_v30 = vrot.slane %v1352_v9, 1  ;;  %v1471_v35 = vsel %vm1228_vm4, %v1333_v23, %v1326_v24 }
 0x4e2   : > { %v1357_v22 = vadd.f32 %v1356_v7, %v1355_v4  ;;  %v1345_v41 = vadd.f32 %v1344_v10, %v1343_v3  ;;  %v1340_v25 = vadd.f32 %v1339_v5, %v1338_v2  ;;  %v1366_v32 = vadd.f32 %v1365_v11, %v1364_v20 }
 0x4e3   : > { %v1369_v19 = vsel %vm925_vm2, %v1319_v12, 0.0  ;;  %v1354_v0 = vadd.f32 %v1353_v30, %v1352_v9 }
 0x4e4   : > { %v1358_v27 = vrot.slane %v1357_v22, 2  ;;  %v1370_v29 = vrot.slane %v1369_v19, 4  ;;  %v1346_v31 = vrot.slane %v1345_v41, 1  ;;  %v1472_v28 = vsel %vm1230_vm5, %v1340_v25, %v1471_v35 }
 0x4e5   : > { %v1367_v6 = vrot.slane %v1366_v32, 1 }
 0x4e6   : > { %v1359_v33 = vadd.f32 %v1358_v27, %v1357_v22  ;;  %v1371_v34 = vadd.f32 %v1370_v29, %v1369_v19  ;;  %v1347_v36 = vadd.f32 %v1346_v31, %v1345_v41 }
 0x4e7   : > { %v1368_v26 = vadd.f32 %v1367_v6, %v1366_v32 }
 0x4e8   : > { %v1360_v21 = vrot.slane %v1359_v33, 1  ;;  %v1372_v37 = vrot.slane %v1371_v34, 2  ;;  %v1473_v38 = vsel %vm1232_vm6, %v1347_v36, %v1472_v28 }
 0x4e9   : > { %v1474_v42 = vsel %vm1234_vm7, %v1354_v0, %v1473_v38 }
 0x4ea   : > { %v1361_v39 = vadd.f32 %v1360_v21, %v1359_v33  ;;  %v1373_v40 = vadd.f32 %v1372_v37, %v1371_v34 }
 0x4ec   : > { %v1374_v43 = vrot.slane %v1373_v40, 1  ;;  %v1475_v1 = vsel %vm1236_vm8, %v1361_v39, %v1474_v42 }
 0x4ed   : > { %v1476_v45 = vsel %vm1238_vm9, %v1368_v26, %v1475_v1 }
 0x4ee   : > { %v1375_v44 = vadd.f32 %v1374_v43, %v1373_v40 }
 0x4f0   : > { %v1477_v14 = vsel %vm1240_vm10, %v1375_v44, %v1476_v45 }
 0x4f1   : > { %2029 = vmatmul.mubr.msk.f32.vlgmr.msra.gmra.mrb[2].mxu1 %vm925_vm2, %v1477_v14 }
 0x4f2   : > { %2586 = shalt.err (!%p2583_p9)
}
 0x4f3   : > { %s2587_s7 = scalar_lea.hbm %s3474_s24, 1024  ;;  %s2591_s5 = scalar_lea.hbm %s3714_s21, 2048 }
 0x4f4   : > { %p2588_p12 = scmp.ne.s32.totalorder %s3474_s24, %s2587_s7  ;;  %p2592_p11 = scmp.lt.u32.totalorder %s3474_s24, %s3714_s21 }
 0x4f5   : > { %p2593_p0 = scmp.lt.u32.totalorder %s2591_s5, %s2587_s7  ;;  %p2595_p2 = scmp.lt.u32.totalorder %s2587_s7, %s3474_s24 }
 0x4f6   : > { %p2589_p10 = pnand %p2588_p12, %p3715_p4 }
 0x4f7   : > { %p2594_p3 = por %p2593_p0, %p2592_p11 }
 0x4f8   : > { %p2590_p5 = pneg %p2589_p10 }
 0x4f9   : > { %p2596_p13 = por %p2595_p2, %p2594_p3 }
 0x4fb   : > { %p2597_p1 = pnand %p2596_p13, %p2590_p5 }
 0x4fd   : > { %2600 = shalt.err (!%p2597_p1)
}
 0x4fe   : > { %s2764_s16 = smov 128   ;;  %s2765_s1 = smov 8   ;;  %v1950_v46 = vld [vmem:[#allocation17] ss:$0 sm:$0xff]  ;;  %v1952_v47 = vld [vmem:[#allocation20] ss:$0 sm:$0xff] }
 0x4ff   : > { %2089 = dma.vmem_to_hbm [thread:$0]  (%p3715_p4), %s3477_s28, 1024, %s3474_s24, %s1554_s20, %s2764_s16, %s2764_s16, %s2765_s1   ;;  %v2044_v13 = vadd.f32 %v1950_v46, %v3334_v15 }
 0x500   : > { %s1959_s0 = sshll.u32 %s3711_s27, 7  ;;  %s741_s13 = scalar_lea.vmem [#allocation23], %s3263_s29 }
 0x501   : > { %v2045_v48 = vadd.f32 %v2044_v13, %v1952_v47  ;;  %s1596_s23 = sshll.u32 %s741_s13, 4  ;;  %s1610_s7 = sshll.u32 %s748_s2, 4  ;;  %s3513_s23 = int_to_ptr.vmem [resolvable:$true] %s1596_s23  ;;  %s3520_s7 = int_to_ptr.vmem [resolvable:$true] %s1610_s7 }
 0x502   : > { %s3716_s5 = sld [smem:[#allocation55_spill]]  ;;  %s3717_s20 = sld [smem:[#allocation56_spill]] }
 0x503   : > { %s1559_s29 = scalar_lea.sflag [#allocation24], %s3272_s26  ;;  %s2601_s2 = scalar_lea.vmem %s3513_s23, 128 }
 0x504   : > { %p2602_p6 = scmp.ne.s32.totalorder %s3513_s23, %s2601_s2  ;;  %s2766_s25 = smov [#allocation23]  }
 0x505   : > { %s2605_s14 = sshll.u32 %s2766_s25, 4  ;;  %s2606_s14 = int_to_ptr.vmem [resolvable:$false] %s2605_s14 }
 0x506   : > { %p2603_p8 = pnand %p2602_p6, %p3715_p4  ;;  %s2607_s16 = scalar_lea.vmem %s2606_s14, 256 }
 0x507   : > { %p2608_p9 = scmp.lt.s32.totalorder %s3513_s23, %s2606_s14  ;;  %p2609_p12 = scmp.lt.s32.totalorder %s2607_s16, %s2601_s2 }
 0x508   : > { %s3511_s19 = scalar_lea.hbm %s3716_s5, %s1959_s0  ;;  %s3518_s27 = scalar_lea.hbm %s3717_s20, %s1959_s0 }
 0x509   : > { %p2604_p7 = pneg %p2603_p8  ;;  %p2610_p10 = por %p2609_p12, %p2608_p9 }
 0x50b   : > { %p2611_p5 = pnand %p2610_p10, %p2604_p7 }
 0x5c4   : > { %v1546_v49 = vpop.f32.mrb[2].mxu1 }
 0x5c5   : > { %v2046_v50 = vadd.f32 %v2045_v48, %v1546_v49  ;;  %v2030_v51 = vpop.f32.mrb[3].mxu1 }
 0x5c7   : > { %1552 = vst.msk [vmem:[%s741_s13] sm:$0xff] %vm841_vm3, %v2046_v50 }
 0x5c8   : > { %2614 = shalt.err (!%p2611_p5)
}
 0x5c9   : > { %s2615_s1 = scalar_lea.hbm %s3511_s19, 128  ;;  %s2619_s4 = scalar_lea.hbm %s3716_s5, 256 }
 0x5ca   : > { %p2616_p11 = scmp.ne.s32.totalorder %s3511_s19, %s2615_s1  ;;  %p2620_p2 = scmp.lt.u32.totalorder %s3511_s19, %s3716_s5 }
 0x5cb   : > { %p2621_p13 = scmp.lt.u32.totalorder %s2619_s4, %s2615_s1  ;;  %p2623_p6 = scmp.lt.u32.totalorder %s2615_s1, %s3511_s19 }
 0x5cc   : > { %p2617_p0 = pnand %p2616_p11, %p3715_p4 }
 0x5cd   : > { %p2622_p1 = por %p2621_p13, %p2620_p2 }
 0x5ce   : > { %p2618_p3 = pneg %p2617_p0 }
 0x5cf   : > { %p2624_p8 = por %p2623_p6, %p2622_p1 }
 0x5d1   : > { %p2625_p7 = pnand %p2624_p8, %p2618_p3 }
 0x5d3   : > { %2628 = shalt.err (!%p2625_p7)
}
 0x5d4   : > { %2090 = dma.vmem_to_hbm [thread:$0]  (%p3715_p4), %s3513_s23, 128, %s3511_s19, %s1559_s29  }
 0x5d5   : > { %s2629_s28 = scalar_lea.vmem %s3520_s7, 128  ;;  %s2767_s2 = smov [#allocation25]  }
 0x5d6   : > { %p2630_p9 = scmp.ne.s32.totalorder %s3520_s7, %s2629_s28  ;;  %s2633_s25 = sshll.u32 %s2767_s2, 4  ;;  %s2634_s25 = int_to_ptr.vmem [resolvable:$false] %s2633_s25 }
 0x5d7   : > { %s2635_s14 = scalar_lea.vmem %s2634_s25, 256  ;;  %p2636_p5 = scmp.lt.s32.totalorder %s3520_s7, %s2634_s25 }
 0x5d8   : > { %p2631_p12 = pnand %p2630_p9, %p3715_p4  ;;  %p2637_p11 = scmp.lt.s32.totalorder %s2635_s14, %s2629_s28 }
 0x5da   : > { %p2632_p10 = pneg %p2631_p12  ;;  %p2638_p0 = por %p2637_p11, %p2636_p5 }
 0x5dc   : > { %p2639_p3 = pnand %p2638_p0, %p2632_p10 }
 0x5de   : > { %2642 = shalt.err (!%p2639_p3)
}
 0x5df   : > { %s2643_s23 = scalar_lea.hbm %s3518_s27, 128  ;;  %s2647_s1 = scalar_lea.hbm %s3717_s20, 256 }
 0x5e0   : > { %p2644_p2 = scmp.ne.s32.totalorder %s3518_s27, %s2643_s23  ;;  %p2648_p6 = scmp.lt.u32.totalorder %s3518_s27, %s3717_s20 }
 0x5e1   : > { %p2649_p8 = scmp.lt.u32.totalorder %s2647_s1, %s2643_s23  ;;  %p2651_p9 = scmp.lt.u32.totalorder %s2643_s23, %s3518_s27 }
 0x5e2   : > { %p2645_p13 = pnand %p2644_p2, %p3715_p4 }
 0x5e3   : > { %p2650_p7 = por %p2649_p8, %p2648_p6 }
 0x5e4   : > { %p2646_p1 = pneg %p2645_p13 }
 0x5e5   : > { %p2652_p12 = por %p2651_p9, %p2650_p7 }
 0x5e7   : > { %p2653_p10 = pnand %p2652_p12, %p2646_p1 }
 0x5e9   : > { %2656 = shalt.err (!%p2653_p10)
}
 0x5ea   : > { %2091 = dma.vmem_to_hbm [thread:$0]  (%p3715_p4), %s3520_s7, 128, %s3518_s27, %s1559_s29  }
 0x5eb PF: > { %s3718_s4 = sld [smem:[#allocation36_spill]]  ;;  %s3719_s15 = sld [smem:[#allocation45_spill]] }
 0x5ec   : > { %p3721_p11 = scmp.ge.s32.totalorder %s2743_s18, 2 }
 0x5f1   : > { %s1622_s24 = sand.u32 1, %s3718_s4   ;;  %p3720_p5 = scmp.ne.s32.totalorder %s3719_s15, 0 }
 0x5f2   : > { %s1623_s28 = scalar_lea.sflag [#allocation4], %s1622_s24 }
 0x5f3   : > { %p2134_p0 = pnand %p3721_p11, %p3720_p5 }
 0x5f5   : > { %2714 = dma.done.wait (!%p2134_p0), %s1623_s28, 1024  }
 0x5f6   : > { %2716 = vsyncadd (!%p2134_p0), %s1623_s28, 4294966272  ;;  %s3722_s2 = sadd.s32 4294967294, %s2743_s18  }
 0x5f7   : > { %s1631_s25 = sand.u32 1, %s3722_s2  }
 0x5f8   : > { %s1632_s3 = scalar_lea.sflag [#allocation24], %s1631_s25 }
 0x5f9   : > { %2718 = dma.done.wait (!%p2134_p0), %s1632_s3, 256  }
 0x5fa   : > { %2720 = vsyncadd (!%p2134_p0), %s1632_s3, 4294967040  ;;  %s44_s18 = sadd.s32 1, %s2743_s18   ;;  %s3723_s26 = sld [smem:[#allocation37_spill]] }
 0x5fb   : > { %p41_p4 = scmp.ge.s32.totalorder %s44_s18, 4   ;;  %s3724_s15 = sld [smem:[#allocation44_spill]] }
 0x5fc   : > { %s3725_s7 = sld [smem:[#allocation41_spill]]  ;;  %s3726_s29 = smov %s2727_s30 }
 0x5fd   : > { %s3728_s16 = smov %s2739_s17  ;;  %43 = sbr.rel (!%p41_p4) target bundleno = 28 (0x1c), region = 214 }
 0x600   : > { %s3727_s30 = smov %s3723_s26 }
 0x602   : > { %s3729_s17 = smov %s3725_s7 }
 0x604   :  { %1646 = vsyncpa [#allocation3], 1 }
 0x605   :  { %1648 = vsyncpa [#allocation3 + $0x1], 1 }
 0x606   :  { %1649 = vsyncpa [#allocation6], 1 }
 0x607   :  { %1651 = vsyncpa [#allocation6 + $0x1], 1 }
 0x608   :  { %1652 = vsyncpa [#allocation9], 1 }
 0x609   :  { %1654 = vsyncpa [#allocation9 + $0x1], 1 }
 0x60a   :  { %1655 = vsyncpa [#allocation12], 1 }
 0x60b   :  { %1656 = vsyncpa [#allocation15], 1 }
 0x60c   :  { %1657 = vsyncpa [#allocation18], 1 }
 0x60d   :  { %1658 = vsyncpa [#allocation21], 1 }
 0x60e   :  { %1659 = vsyncpa [#allocation4], 1 }
 0x60f   :  { %1661 = vsyncpa [#allocation4 + $0x1], 1 }
 0x610   :  { %1662 = vsyncpa [#allocation24], 1 }
 0x611   :  { %1664 = vsyncpa [#allocation24 + $0x1], 1 }

</bundles_post_ra>
